<compile_context>
chip_gen: v6e
topology: v6e:2x2x1
jax: 0.10.0
libtpu: 0.0.40
codegen_flags: <defaults>
</compile_context>

<pallas_src>
import jax
import jax.numpy as jnp
from jax.experimental import pallas as pl
from jax.experimental.pallas import tpu as pltpu


def _make_mlp_kernel(total_rows, tile_rows, needs_mask):
    """Builds the fused 5-layer kernel for one batch tile.

    Activations after layer 1 are [features, batch_tile] (batch on lanes).
    Weights for layers 1-4 keep the PyTorch [out, in] layout in bf16; the final
    layer's weight is passed as [in, 1] f32 for the VPU tail.
    Biases are [out, 1] f32 (broadcast over the lane/batch axis).
    """

    def kernel(x_ref,
               w1_ref, b1_ref,
               w2_ref, b2_ref,
               w3_ref, b3_ref,
               w4_ref, b4_ref,
               w5_ref, b5_ref,
               o_ref):
        x = x_ref[...]                                    # [BT, F] f32 from HBM
        if needs_mask:
            # Zero the overhanging rows of the ragged last tile so padded lanes
            # never carry garbage/NaN (cheap: one iota + where on [BT, F]).
            row = jax.lax.broadcasted_iota(jnp.int32, (tile_rows, 1), 0)
            row = row + pl.program_id(0) * tile_rows
            x = jnp.where(row < total_rows, x, 0.0)
        xb = x.astype(w1_ref.dtype)                       # bf16 for the MXU

        def mxu_layer(h, w_ref, b_ref):
            # [out, in] bf16 @ [in, BT] bf16 -> f32 accumulation on the MXU.
            acc = jnp.dot(w_ref[...], h, preferred_element_type=jnp.float32)
            return jnp.maximum(acc + b_ref[...], 0.0)

        # Layer 1: contract the F axis of both W1 [2F, F] and the x block
        # [BT, F] (== pl.dot trans_b), producing batch-on-lanes activations
        # without any wrapper-side transpose.
        h = jax.lax.dot_general(
            w1_ref[...], xb, (((1,), (1,)), ((), ())),
            preferred_element_type=jnp.float32)           # [2F, BT] f32
        h = jnp.maximum(h + b1_ref[...], 0.0).astype(w1_ref.dtype)

        h = mxu_layer(h, w2_ref, b2_ref).astype(w1_ref.dtype)   # [F,   BT]
        h = mxu_layer(h, w3_ref, b3_ref).astype(w1_ref.dtype)   # [F/2, BT]
        h = mxu_layer(h, w4_ref, b4_ref)                        # [F/4, BT] f32

        # Final Linear(F/4 -> 1), no ReLU.  K=8 / M=1 on the MXU is almost pure
        # fill/drain latency, so use the (otherwise idle) VPU + XLU instead:
        # broadcast-multiply over lanes, then reduce across the 8 sublanes.
        out = jnp.sum(w5_ref[...] * h, axis=0, keepdims=True) + b5_ref[...]
        o_ref[...] = out.astype(o_ref.dtype)              # [1, BT] lane-dense

    return kernel


def mlp_forward(x, params, *, batch_tile=4096, compute_dtype=jnp.bfloat16):
    """Fused MLP forward.

    x:      [B, F] array (f32).
    params: list of (W [out, in] f32, b [out] f32) in PyTorch nn.Linear layout.
    Returns [B, 1] in x.dtype.
    """
    B, F = x.shape
    dims = [F] + [w.shape[0] for (w, _) in params]
    out_dim = dims[-1]

    # Batch lives on the lane axis of the activations: pick a large tile
    # (>= 512 lanes for HBM-roofline efficiency, default 4096), but shrink for
    # small batches so the "parallel" grid keeps >= 2 steps (v7x megacore).
    bt = max(512, (batch_tile // 512) * 512)
    while bt > 512 and pl.cdiv(B, bt) < 2:
        bt = max(512, ((bt // 2) // 512) * 512)
    n_tiles = pl.cdiv(B, bt)
    needs_mask = (B % bt) != 0

    n_layers = len(params)
    flat = []
    in_specs = [pl.BlockSpec((bt, F), lambda i: (i, 0))]     # x: [B, F] f32, no copy
    for li, (w, b) in enumerate(params):
        if li == n_layers - 1:
            # Final layer runs on the VPU: store its weight as [in, 1] f32 so it
            # broadcasts over the lane (batch) axis directly.
            w = jnp.transpose(w).astype(jnp.float32)          # [F/4, 1]
        else:
            w = w.astype(compute_dtype)                       # [out, in] bf16
        b = b.reshape(-1, 1).astype(jnp.float32)              # [out, 1] f32
        flat.extend([w, b])
        # Parameters are KB-sized; whole tensors resident every grid step.
        # TODO(synk): pipeline_mode=pl.Buffered(1) on these constant-index blocks
        # would drop the redundant double-buffer copies once universally supported.
        in_specs.append(pl.BlockSpec(w.shape, lambda i: (0, 0)))
        in_specs.append(pl.BlockSpec(b.shape, lambda i: (0, 0)))

    out_specs = pl.BlockSpec((out_dim, bt), lambda i: (0, i))

    # Truthful cost hint: x is read once as f32 inside the kernel.
    flops = 2 * B * sum(dims[i] * dims[i + 1] for i in range(len(dims) - 1))
    param_bytes = sum(int(a.size) * a.dtype.itemsize for a in flat)
    bytes_accessed = (int(x.size) * x.dtype.itemsize
                      + param_bytes
                      + B * out_dim * 4)
    cost = pl.CostEstimate(flops=flops, transcendentals=0,
                           bytes_accessed=bytes_accessed)

    # Generation-aware VMEM budget (v7x only has 64 MiB per TensorCore).
    try:
        vmem_cap = int(getattr(pltpu.get_tpu_info(),
                               "vmem_capacity_bytes", 64 << 20))
    except Exception:  # pragma: no cover - e.g. interpret mode off-TPU
        vmem_cap = 64 << 20
    act_bytes = 2 * bt * (F + out_dim) * 4            # double-buffered x / out tiles
    inter_bytes = bt * sum(dims) * 6                  # f32 + bf16 intermediates
    needed = act_bytes + 2 * param_bytes + inter_bytes + (8 << 20)
    vmem_limit = int(max(32 << 20, min(needed, (vmem_cap * 3) // 4)))

    out_t = pl.pallas_call(
        _make_mlp_kernel(B, bt, needs_mask),
        out_shape=jax.ShapeDtypeStruct((out_dim, B), x.dtype),
        grid_spec=pltpu.PrefetchScalarGridSpec(
            num_scalar_prefetch=0,
            grid=(n_tiles,),
            in_specs=in_specs,
            out_specs=out_specs,
        ),
        compiler_params=pltpu.CompilerParams(
            dimension_semantics=("parallel",),
            vmem_limit_bytes=vmem_limit),
        cost_estimate=cost,
    )(x, *flat)

    # [1, B] lane-dense kernel output -> [B, 1] (tiny XLA transpose).
    return jnp.transpose(out_t)


def init_params(num_features, key):
    """PyTorch nn.Linear-style init: W [out, in], b [out], U[-1/sqrt(in), 1/sqrt(in)]."""
    dims = [num_features,
            2 * num_features,
            num_features,
            num_features // 2,
            num_features // 4,
            1]
    params = []
    for i in range(len(dims) - 1):
        d_in, d_out = dims[i], dims[i + 1]
        key, kw, kb = jax.random.split(key, 3)
        bound = 1.0 / (d_in ** 0.5)
        w = jax.random.uniform(kw, (d_out, d_in), jnp.float32, -bound, bound)
        b = jax.random.uniform(kb, (d_out,), jnp.float32, -bound, bound)
        params.append((w, b))
    return params


def mlp_reference(x, params, compute_dtype=jnp.bfloat16):
    """Pure-JAX reference mirroring the kernel arithmetic
    (bf16 MXU inputs, f32 accumulation, f32 VPU final layer)."""
    n = len(params)
    h = x.astype(compute_dtype)
    for i, (w, b) in enumerate(params[:-1]):
        h = jnp.dot(h, w.astype(compute_dtype).T,
                    preferred_element_type=jnp.float32) + b[None, :]
        h = jnp.maximum(h, 0.0)
        if i < n - 2:
            h = h.astype(compute_dtype)   # last hidden layer stays f32
    w5, b5 = params[-1]
    out = jnp.dot(h, w5.astype(jnp.float32).T) + b5[None, :]
    return out.astype(x.dtype)


if __name__ == "__main__":
    num_features = 32

    key = jax.random.PRNGKey(0)
    key, kx1, kx2 = jax.random.split(key, 3)
    params = init_params(num_features, key)

    # Case 1: multi-tile + ragged tail (1200 -> tile 1024 -> 2 grid steps).
    x1 = jax.random.normal(kx1, (1200, num_features), jnp.float32)
    out1 = jax.block_until_ready(mlp_forward(x1, params))
    ref1 = mlp_reference(x1, params)
    assert out1.shape == (1200, 1), out1.shape
    assert jnp.allclose(out1, ref1, atol=3e-2, rtol=3e-2), \
        float(jnp.max(jnp.abs(out1 - ref1)))

    # Case 2: single ragged tile (small batch path).
    x2 = jax.random.normal(kx2, (300, num_features), jnp.float32)
    out2 = jax.block_until_ready(mlp_forward(x2, params))
    ref2 = mlp_reference(x2, params)
    assert out2.shape == (300, 1), out2.shape
    assert jnp.allclose(out2, ref2, atol=3e-2, rtol=3e-2), \
        float(jnp.max(jnp.abs(out2 - ref2)))

    print("KERNEL_OK")
</pallas_src>

<mosaic_0001>
module attributes {stable_mosaic.version = 11 : i64} {
  func.func @kernel(%arg0: i32, %arg1: memref<1024x32xf32, #tpu.memory_space<vmem>>, %arg2: memref<64x32xbf16, #tpu.memory_space<vmem>>, %arg3: memref<64x1xf32, #tpu.memory_space<vmem>>, %arg4: memref<32x64xbf16, #tpu.memory_space<vmem>>, %arg5: memref<32x1xf32, #tpu.memory_space<vmem>>, %arg6: memref<16x32xbf16, #tpu.memory_space<vmem>>, %arg7: memref<16x1xf32, #tpu.memory_space<vmem>>, %arg8: memref<8x16xbf16, #tpu.memory_space<vmem>>, %arg9: memref<8x1xf32, #tpu.memory_space<vmem>>, %arg10: memref<8x1xf32, #tpu.memory_space<vmem>>, %arg11: memref<1x1xf32, #tpu.memory_space<vmem>>, %arg12: memref<1x1024xf32, #tpu.memory_space<vmem>>) attributes {dimension_semantics = [#tpu.dimension_semantics<parallel>], iteration_bounds = array<i64: 2>, scalar_prefetch = 0 : i64, scratch_operands = 0 : i64, tpu.core_type = #tpu.core_type<tc>, window_params = [{transform_indices = @transform_0, window_bounds = array<i64: 1024, 32>}, {pipeline_mode = #tpu.pipeline_mode<synchronous>, transform_indices = @transform_1, window_bounds = array<i64: 64, 32>}, {pipeline_mode = #tpu.pipeline_mode<synchronous>, transform_indices = @transform_2, window_bounds = array<i64: 64, 1>}, {pipeline_mode = #tpu.pipeline_mode<synchronous>, transform_indices = @transform_3, window_bounds = array<i64: 32, 64>}, {pipeline_mode = #tpu.pipeline_mode<synchronous>, transform_indices = @transform_4, window_bounds = array<i64: 32, 1>}, {pipeline_mode = #tpu.pipeline_mode<synchronous>, transform_indices = @transform_5, window_bounds = array<i64: 16, 32>}, {pipeline_mode = #tpu.pipeline_mode<synchronous>, transform_indices = @transform_6, window_bounds = array<i64: 16, 1>}, {pipeline_mode = #tpu.pipeline_mode<synchronous>, transform_indices = @transform_7, window_bounds = array<i64: 8, 16>}, {pipeline_mode = #tpu.pipeline_mode<synchronous>, transform_indices = @transform_8, window_bounds = array<i64: 8, 1>}, {pipeline_mode = #tpu.pipeline_mode<synchronous>, transform_indices = @transform_9, window_bounds = array<i64: 8, 1>}, {pipeline_mode = #tpu.pipeline_mode<synchronous>, transform_indices = @transform_10, window_bounds = array<i64: 1, 1>}, {transform_indices = @transform_11, window_bounds = array<i64: 1, 1024>}]} {
    %c0 = arith.constant 0 : index
    %c0_0 = arith.constant 0 : index
    %0 = vector.load %arg1[%c0, %c0_0] : memref<1024x32xf32, #tpu.memory_space<vmem>>, vector<1024x32xf32>
    %1 = tpu.iota {dimensions = array<i32: 0>} : vector<1024x1xi32>
    %c1024_i32 = arith.constant 1024 : i32
    %2 = arith.muli %arg0, %c1024_i32 : i32
    %3 = vector.broadcast %2 : i32 to vector<1024x1xi32>
    %4 = arith.addi %1, %3 : vector<1024x1xi32>
    %c1200_i32 = arith.constant 1200 : i32
    %5 = vector.broadcast %c1200_i32 : i32 to vector<1024x1xi32>
    %6 = arith.cmpi slt, %4, %5 : vector<1024x1xi32>
    %cst = arith.constant 0.000000e+00 : f32
    %7 = vector.shape_cast %6 : vector<1024x1xi1> to vector<1024x1xi1>
    %8 = vector.broadcast %7 : vector<1024x1xi1> to vector<1024x32xi1>
    %9 = vector.broadcast %cst : f32 to vector<1024x32xf32>
    %10 = arith.select %8, %0, %9 : vector<1024x32xi1>, vector<1024x32xf32>
    %11 = arith.truncf %10 : vector<1024x32xf32> to vector<1024x32xbf16>
    %c0_1 = arith.constant 0 : index
    %c0_2 = arith.constant 0 : index
    %12 = vector.load %arg2[%c0_1, %c0_2] : memref<64x32xbf16, #tpu.memory_space<vmem>>, vector<64x32xbf16>
    %cst_3 = arith.constant dense<0.000000e+00> : vector<64x1024xf32>
    %13 = tpu.matmul %12, %11, %cst_3 {dimension_numbers = #tpu.dot_dimension_numbers<[1], [1], [0], [0], [0, 0, 1, 0], [], []>} : vector<64x32xbf16>, vector<1024x32xbf16>, vector<64x1024xf32> -> vector<64x1024xf32>
    %c0_4 = arith.constant 0 : index
    %c0_5 = arith.constant 0 : index
    %14 = vector.load %arg3[%c0_4, %c0_5] : memref<64x1xf32, #tpu.memory_space<vmem>>, vector<64x1xf32>
    %15 = vector.broadcast %14 : vector<64x1xf32> to vector<64x1024xf32>
    %16 = arith.addf %13, %15 : vector<64x1024xf32>
    %cst_6 = arith.constant 0.000000e+00 : f32
    %17 = vector.broadcast %cst_6 : f32 to vector<64x1024xf32>
    %18 = arith.maximumf %16, %17 : vector<64x1024xf32>
    %19 = arith.truncf %18 : vector<64x1024xf32> to vector<64x1024xbf16>
    %c0_7 = arith.constant 0 : index
    %c0_8 = arith.constant 0 : index
    %20 = vector.load %arg4[%c0_7, %c0_8] : memref<32x64xbf16, #tpu.memory_space<vmem>>, vector<32x64xbf16>
    %cst_9 = arith.constant dense<0.000000e+00> : vector<32x1024xf32>
    %21 = tpu.matmul %20, %19, %cst_9 {dimension_numbers = #tpu.dot_dimension_numbers<[1], [0], [0], [1], [0, 0, 1, 1], [], []>} : vector<32x64xbf16>, vector<64x1024xbf16>, vector<32x1024xf32> -> vector<32x1024xf32>
    %c0_10 = arith.constant 0 : index
    %c0_11 = arith.constant 0 : index
    %22 = vector.load %arg5[%c0_10, %c0_11] : memref<32x1xf32, #tpu.memory_space<vmem>>, vector<32x1xf32>
    %23 = vector.broadcast %22 : vector<32x1xf32> to vector<32x1024xf32>
    %24 = arith.addf %21, %23 : vector<32x1024xf32>
    %cst_12 = arith.constant 0.000000e+00 : f32
    %25 = vector.broadcast %cst_12 : f32 to vector<32x1024xf32>
    %26 = arith.maximumf %24, %25 : vector<32x1024xf32>
    %27 = arith.truncf %26 : vector<32x1024xf32> to vector<32x1024xbf16>
    %c0_13 = arith.constant 0 : index
    %c0_14 = arith.constant 0 : index
    %28 = vector.load %arg6[%c0_13, %c0_14] : memref<16x32xbf16, #tpu.memory_space<vmem>>, vector<16x32xbf16>
    %cst_15 = arith.constant dense<0.000000e+00> : vector<16x1024xf32>
    %29 = tpu.matmul %28, %27, %cst_15 {dimension_numbers = #tpu.dot_dimension_numbers<[1], [0], [0], [1], [0, 0, 1, 1], [], []>} : vector<16x32xbf16>, vector<32x1024xbf16>, vector<16x1024xf32> -> vector<16x1024xf32>
    %c0_16 = arith.constant 0 : index
    %c0_17 = arith.constant 0 : index
    %30 = vector.load %arg7[%c0_16, %c0_17] : memref<16x1xf32, #tpu.memory_space<vmem>>, vector<16x1xf32>
    %31 = vector.broadcast %30 : vector<16x1xf32> to vector<16x1024xf32>
    %32 = arith.addf %29, %31 : vector<16x1024xf32>
    %cst_18 = arith.constant 0.000000e+00 : f32
    %33 = vector.broadcast %cst_18 : f32 to vector<16x1024xf32>
    %34 = arith.maximumf %32, %33 : vector<16x1024xf32>
    %35 = arith.truncf %34 : vector<16x1024xf32> to vector<16x1024xbf16>
    %c0_19 = arith.constant 0 : index
    %c0_20 = arith.constant 0 : index
    %36 = vector.load %arg8[%c0_19, %c0_20] : memref<8x16xbf16, #tpu.memory_space<vmem>>, vector<8x16xbf16>
    %cst_21 = arith.constant dense<0.000000e+00> : vector<8x1024xf32>
    %37 = tpu.matmul %36, %35, %cst_21 {dimension_numbers = #tpu.dot_dimension_numbers<[1], [0], [0], [1], [0, 0, 1, 1], [], []>} : vector<8x16xbf16>, vector<16x1024xbf16>, vector<8x1024xf32> -> vector<8x1024xf32>
    %c0_22 = arith.constant 0 : index
    %c0_23 = arith.constant 0 : index
    %38 = vector.load %arg9[%c0_22, %c0_23] : memref<8x1xf32, #tpu.memory_space<vmem>>, vector<8x1xf32>
    %39 = vector.broadcast %38 : vector<8x1xf32> to vector<8x1024xf32>
    %40 = arith.addf %37, %39 : vector<8x1024xf32>
    %cst_24 = arith.constant 0.000000e+00 : f32
    %41 = vector.broadcast %cst_24 : f32 to vector<8x1024xf32>
    %42 = arith.maximumf %40, %41 : vector<8x1024xf32>
    %c0_25 = arith.constant 0 : index
    %c0_26 = arith.constant 0 : index
    %43 = vector.load %arg10[%c0_25, %c0_26] : memref<8x1xf32, #tpu.memory_space<vmem>>, vector<8x1xf32>
    %44 = vector.broadcast %43 : vector<8x1xf32> to vector<8x1024xf32>
    %45 = arith.mulf %44, %42 : vector<8x1024xf32>
    %cst_27 = arith.constant dense<0.000000e+00> : vector<1024xf32>
    %46 = vector.multi_reduction <add>, %45, %cst_27 [0] : vector<8x1024xf32> to vector<1024xf32>
    %47 = vector.shape_cast %46 : vector<1024xf32> to vector<1x1024xf32>
    %c0_28 = arith.constant 0 : index
    %c0_29 = arith.constant 0 : index
    %48 = vector.load %arg11[%c0_28, %c0_29] : memref<1x1xf32, #tpu.memory_space<vmem>>, vector<1x1xf32>
    %49 = vector.broadcast %48 : vector<1x1xf32> to vector<1x1024xf32>
    %50 = arith.addf %47, %49 : vector<1x1024xf32>
    %c0_30 = arith.constant 0 : index
    %c0_31 = arith.constant 0 : index
    %51 = vector.load %arg12[%c0_30, %c0_31] : memref<1x1024xf32, #tpu.memory_space<vmem>>, vector<1x1024xf32>
    tpu.vector_store %arg12[%c0_30, %c0_31], %50 {strides = array<i32>} : memref<1x1024xf32, #tpu.memory_space<vmem>>, vector<1x1024xf32>,
    return
  }
  func.func @transform_0(%arg0: i32) -> (i32, i32) {
    %c0_i32 = arith.constant 0 : i32
    %c0_i32_0 = arith.constant 0 : i32
    return %arg0, %c0_i32 : i32, i32
  }
  func.func @transform_1(%arg0: i32) -> (i32, i32) {
    %c0_i32 = arith.constant 0 : i32
    %c0_i32_0 = arith.constant 0 : i32
    %c0_i32_1 = arith.constant 0 : i32
    return %c0_i32, %c0_i32_0 : i32, i32
  }
  func.func @transform_2(%arg0: i32) -> (i32, i32) {
    %c0_i32 = arith.constant 0 : i32
    %c0_i32_0 = arith.constant 0 : i32
    %c0_i32_1 = arith.constant 0 : i32
    return %c0_i32, %c0_i32_0 : i32, i32
  }
  func.func @transform_3(%arg0: i32) -> (i32, i32) {
    %c0_i32 = arith.constant 0 : i32
    %c0_i32_0 = arith.constant 0 : i32
    %c0_i32_1 = arith.constant 0 : i32
    return %c0_i32, %c0_i32_0 : i32, i32
  }
  func.func @transform_4(%arg0: i32) -> (i32, i32) {
    %c0_i32 = arith.constant 0 : i32
    %c0_i32_0 = arith.constant 0 : i32
    %c0_i32_1 = arith.constant 0 : i32
    return %c0_i32, %c0_i32_0 : i32, i32
  }
  func.func @transform_5(%arg0: i32) -> (i32, i32) {
    %c0_i32 = arith.constant 0 : i32
    %c0_i32_0 = arith.constant 0 : i32
    %c0_i32_1 = arith.constant 0 : i32
    return %c0_i32, %c0_i32_0 : i32, i32
  }
  func.func @transform_6(%arg0: i32) -> (i32, i32) {
    %c0_i32 = arith.constant 0 : i32
    %c0_i32_0 = arith.constant 0 : i32
    %c0_i32_1 = arith.constant 0 : i32
    return %c0_i32, %c0_i32_0 : i32, i32
  }
  func.func @transform_7(%arg0: i32) -> (i32, i32) {
    %c0_i32 = arith.constant 0 : i32
    %c0_i32_0 = arith.constant 0 : i32
    %c0_i32_1 = arith.constant 0 : i32
    return %c0_i32, %c0_i32_0 : i32, i32
  }
  func.func @transform_8(%arg0: i32) -> (i32, i32) {
    %c0_i32 = arith.constant 0 : i32
    %c0_i32_0 = arith.constant 0 : i32
    %c0_i32_1 = arith.constant 0 : i32
    return %c0_i32, %c0_i32_0 : i32, i32
  }
  func.func @transform_9(%arg0: i32) -> (i32, i32) {
    %c0_i32 = arith.constant 0 : i32
    %c0_i32_0 = arith.constant 0 : i32
    %c0_i32_1 = arith.constant 0 : i32
    return %c0_i32, %c0_i32_0 : i32, i32
  }
  func.func @transform_10(%arg0: i32) -> (i32, i32) {
    %c0_i32 = arith.constant 0 : i32
    %c0_i32_0 = arith.constant 0 : i32
    %c0_i32_1 = arith.constant 0 : i32
    return %c0_i32, %c0_i32_0 : i32, i32
  }
  func.func @transform_11(%arg0: i32) -> (i32, i32) {
    %c0_i32 = arith.constant 0 : i32
    %c0_i32_0 = arith.constant 0 : i32
    return %c0_i32, %arg0 : i32, i32
  }
}

</mosaic_0001>

<bundles_post_ra>
// kernel: tpu_custom_call.1
= control target key start
LH: loop header
LB: loop body
LE: loop exit
PB: predicated region body
PF: predicated region fallthrough
CT: control target
= control target key end

     0   :  { %s4338_s0 = inlined_call_operand.vmem [shape: f32[1200,32], index: 0, kind: input, shape index: {}]   ;;  %s4339_s1 = inlined_call_operand.vmem [shape: bf16[64,32], index: 1, kind: input, shape index: {}]   ;;  %s4340_s2 = inlined_call_operand.vmem [shape: f32[64,1], index: 2, kind: input, shape index: {}]   ;;  %s4341_s3 = inlined_call_operand.vmem [shape: bf16[32,64], index: 3, kind: input, shape index: {}]   ;;  %s4342_s4 = inlined_call_operand.vmem [shape: f32[32,1], index: 4, kind: input, shape index: {}]   ;;  %s4343_s5 = inlined_call_operand.vmem [shape: bf16[16,32], index: 5, kind: input, shape index: {}]   ;;  %s4344_s6 = inlined_call_operand.vmem [shape: f32[16,1], index: 6, kind: input, shape index: {}]   ;;  %s4345_s7 = inlined_call_operand.vmem [shape: bf16[8,16], index: 7, kind: input, shape index: {}]   ;;  %s4346_s8 = inlined_call_operand.vmem [shape: f32[8,1], index: 8, kind: input, shape index: {}]   ;;  %s4347_s9 = inlined_call_operand.vmem [shape: f32[8,1], index: 9, kind: input, shape index: {}]   ;;  %s4348_s10 = inlined_call_operand.<no memory space> [shape: f32[1,1], index: 10, kind: input, shape index: {}]   ;;  %s4349_s11 = inlined_call_operand.hbm [shape: f32[1,1200], index: 11, kind: output, shape index: {}]  }
   0x1   :  { %v16_v0 = vstv %s4348_s10 }
   0x2   :  { %17 = vst [vmem:[#allocation2] sm:$0x1] %v16_v0 }
   0x3   :  { %18 = vsyncpa [#allocation4], 0 }
   0x4   :  { %20 = vsyncpa [#allocation4 + $0x1], 0  ;;  %s3332_s19 = smov 0   ;;  %s3334_s20 = smov 0  }
   0x5   :  { %s3336_s21 = smov 0   ;;  %s3338_s22 = smov 0  }
   0x6 LB: > { %s3353_s10 = sadd.s32 4294967295, %s3264_s22   ;;  %s2971_s23 = sadd.s32 4294967294, %s3264_s22   ;;  %s3264_s22 = sphi %s3338_s22, %s4355_s22   ;;  %s3260_s21 = sphi %s3336_s21, %s4354_s21   ;;  %s3256_s20 = sphi %s3334_s20, %s4353_s20   ;;  %s3252_s19 = sphi %s3332_s19, %s4352_s19  }
   0x7   : > { %s3357_s24 = sadd.s32 1, %s3264_s22   ;;  %s269_s25 = sadd.s32 1, %s3260_s21 }
   0x8   : > { %s266_s26 = ssub.s32 %s3264_s22, %s3357_s24  ;;  %p279_p0 = scmp.ne.s32.totalorder %s3260_s21, %s3256_s20 }
   0x9   : > { %p267_p1 = scmp.eq.s32.totalorder %s266_s26, 0  ;;  %p280_p2 = scmp.eq.s32.totalorder %s3353_s10, 1 }
   0xa   : > { %p285_p3 = scmp.ne.s32.totalorder %s3256_s20, %s3252_s19  ;;  %p286_p4 = scmp.eq.s32.totalorder %s2971_s23, 1 }
   0xb   : > { %s3368_s27 = scalar_select %p267_p1, %s3260_s21, %s269_s25  }
   0xc   : > { %p3370_p5 = por %p280_p2, %p279_p0  ;;  %p3374_p6 = por %p286_p4, %p285_p3 }
   0xd   : > { %p2974_p7 = scmp.ge.s32.totalorder %s3264_s22, 1  ;;  %p351_p8 = scmp.lt.s32.totalorder %s3264_s22, 3 }
   0xf   : > { %p352_p9 = pnand %p2974_p7, %p351_p8 }
  0x10   : > { %s3381_s30 = sshll.u32 (!%p352_p9), %s3353_s10, 7  ;;  %s2978_s12 = sshll.u32 (!%p352_p9), %s3353_s10, 10 }
  0x11   : > { %355 = sbr.rel (%p352_p9) target bundleno = 1115 (0x45b), region = 64  ;;  %p400_p10 = scmp.lt.s32.totalorder (!%p352_p9), %s3381_s30, 149 }
  0x12   : > { %s392_s18 = sand.u32 (!%p352_p9), 1, %s3256_s20  }
  0x13   : > { %s2975_s25 = sshll.u32 (!%p352_p9), %s392_s18, 3 }
  0x14   : > { %s394_s26 = scalar_lea.vmem (!%p352_p9), [#allocation3], %s2975_s25 }
  0x16   : > { %v543_v1 = vlaneseq  ;;  %v3387_v2 = vld [vmem:[%s4339_s1] sm:$0xff]   ;;  %vm1454_vm0 = vcmask 261120   ;;  %s401_s15 = scalar_select %p400_p10, %s3381_s30, 149  ;;  %v3397_v4 = vstv %s2978_s12 }
  0x17   : > { %3042 = vmatprep.mubr.msk.bf16.mxu0 %vm1454_vm0, %v3387_v2  ;;  %3066 = vmatprep.mubr.msk.bf16.mxu1 %vm1454_vm0, %v3387_v2  ;;  %s4291_s12 = scalar_lea.sflag [#allocation4], %s392_s18  ;;  %s3019_s13 = sshll.u32 (%p3370_p5), %s3353_s10, 3 }
  0x18   : > { %v3390_v3 = vshrl.u32 %v543_v1, 7  ;;  %s2977_s16 = sshll.u32 %s401_s15, 3  ;;  %s2901_s14 = ssub.s32 (%p3370_p5), 10, %s3019_s13 }
  0x19   : > { %s3410_s23 = scalar_lea.vmem %s4338_s0, %s2977_s16  ;;  %p2902_p11 = scmp.lt.s32.totalorder (%p3370_p5), %s2901_s14, 8 }
  0x1a   : > { %v574_v5 = vadd.s32 240, %v3390_v3  ;;  %v575_v6 = vadd.s32 248, %v3390_v3  ;;  %v606_v7 = vadd.s32 496, %v3390_v3  ;;  %v607_v8 = vadd.s32 504, %v3390_v3  ;;  %v445_v17 = vld [vmem:[%s3410_s23 + $0xf0] sm:$0xff]  ;;  %v446_v18 = vld [vmem:[%s3410_s23 + $0xf8] sm:$0xff] }
  0x1b   : > { %v558_v9 = vadd.s32 112, %v3390_v3  ;;  %v559_v10 = vadd.s32 120, %v3390_v3  ;;  %v590_v11 = vadd.s32 368, %v3390_v3  ;;  %v591_v12 = vadd.s32 376, %v3390_v3  ;;  %v477_v19 = vld [vmem:[%s3410_s23 + $0x1f0] sm:$0xff]  ;;  %v478_v24 = vld [vmem:[%s3410_s23 + $0x1f8] sm:$0xff] }
  0x1c   : > { %v704_v13 = vadd.s32 %v3397_v4, %v574_v5  ;;  %v705_v14 = vadd.s32 %v3397_v4, %v575_v6  ;;  %v736_v15 = vadd.s32 %v3397_v4, %v606_v7  ;;  %v737_v16 = vadd.s32 %v3397_v4, %v607_v8  ;;  %v429_v25 = vld [vmem:[%s3410_s23 + $0x70] sm:$0xff]  ;;  %v430_v30 = vld [vmem:[%s3410_s23 + $0x78] sm:$0xff]  ;;  %v443_v46 = vld [vmem:[%s3410_s23 + $0xe0] sm:$0xff] }
  0x1d   : > { %v688_v20 = vadd.s32 %v3397_v4, %v558_v9  ;;  %v689_v21 = vadd.s32 %v3397_v4, %v559_v10  ;;  %v720_v22 = vadd.s32 %v3397_v4, %v590_v11  ;;  %v721_v23 = vadd.s32 %v3397_v4, %v591_v12  ;;  %v461_v31 = vld [vmem:[%s3410_s23 + $0x170] sm:$0xff]  ;;  %v462_v34 = vld [vmem:[%s3410_s23 + $0x178] sm:$0xff]  ;;  %v444_v51 = vld [vmem:[%s3410_s23 + $0xe8] sm:$0xff] }
  0x1e   : > { %vm832_vm1 = vcmp.lt.s32.totalorder %v704_v13, 1200  ;;  %vm833_vm2 = vcmp.lt.s32.totalorder %v705_v14, 1200  ;;  %vm864_vm3 = vcmp.lt.s32.totalorder %v736_v15, 1200  ;;  %vm865_vm4 = vcmp.lt.s32.totalorder %v737_v16, 1200  ;;  %v475_v53 = vld [vmem:[%s3410_s23 + $0x1e0] sm:$0xff]  ;;  %v476_v54 = vld [vmem:[%s3410_s23 + $0x1e8] sm:$0xff] }
  0x1f   : > { %v1216_v26 = vsel %vm832_vm1, %v445_v17, 0.0  ;;  %v1217_v27 = vsel %vm833_vm2, %v446_v18, 0.0  ;;  %v1248_v28 = vsel %vm864_vm3, %v477_v19, 0.0  ;;  %v1249_v29 = vsel %vm865_vm4, %v478_v24, 0.0  ;;  %v427_v57 = vld [vmem:[%s3410_s23 + $0x60] sm:$0xff]  ;;  %v428_v62 = vld [vmem:[%s3410_s23 + $0x68] sm:$0xff] }
  0x20   : > { %v1329_v32 = vpack.c.bf16 %v1217_v27, %v1216_v26  ;;  %v1345_v33 = vpack.c.bf16 %v1249_v29, %v1248_v28  ;;  %vm816_vm5 = vcmp.lt.s32.totalorder %v688_v20, 1200  ;;  %vm817_vm6 = vcmp.lt.s32.totalorder %v689_v21, 1200  ;;  %v459_v9 = vld [vmem:[%s3410_s23 + $0x160] sm:$0xff]  ;;  %v460_v17 = vld [vmem:[%s3410_s23 + $0x168] sm:$0xff]  ;;  %v441_v19 = vld [vmem:[%s3410_s23 + $0xd0] sm:$0xff] }
  0x21   : > { %v1200_v35 = vsel %vm816_vm5, %v429_v25, 0.0  ;;  %v1201_v36 = vsel %vm817_vm6, %v430_v30, 0.0  ;;  %vm848_vm7 = vcmp.lt.s32.totalorder %v720_v22, 1200  ;;  %vm849_vm8 = vcmp.lt.s32.totalorder %v721_v23, 1200  ;;  %v442_v24 = vld [vmem:[%s3410_s23 + $0xd8] sm:$0xff]  ;;  %v473_v26 = vld [vmem:[%s3410_s23 + $0x1d0] sm:$0xff] }
  0x22   : > { %3122 = vmatprep.subr.msk.bf16.mxu0 %vm1454_vm0, %v1329_v32  ;;  %3130 = vmatprep.subr.msk.bf16.mxu1 %vm1454_vm0, %v1345_v33  ;;  %v1321_v37 = vpack.c.bf16 %v1201_v36, %v1200_v35  ;;  %v1232_v38 = vsel %vm848_vm7, %v461_v31, 0.0  ;;  %v1233_v39 = vsel %vm849_vm8, %v462_v34, 0.0  ;;  %v572_v40 = vadd.s32 224, %v3390_v3  ;;  %v474_v28 = vld [vmem:[%s3410_s23 + $0x1d8] sm:$0xff] }
  0x23   : > { %v1337_v41 = vpack.c.bf16 %v1233_v39, %v1232_v38  ;;  %v573_v42 = vadd.s32 232, %v3390_v3  ;;  %v604_v43 = vadd.s32 480, %v3390_v3  ;;  %v605_v44 = vadd.s32 488, %v3390_v3  ;;  %v425_v38 = vld [vmem:[%s3410_s23 + $0x50] sm:$0xff]  ;;  %v426_v39 = vld [vmem:[%s3410_s23 + $0x58] sm:$0xff] }
  0x24   : > { %v1489_v45 = vsel %vm1454_vm0, %v1321_v37, 0  ;;  %v702_v47 = vadd.s32 %v3397_v4, %v572_v40  ;;  %v556_v48 = vadd.s32 96, %v3390_v3  ;;  %v557_v49 = vadd.s32 104, %v3390_v3 }
  0x25   : > { %3027 = vmatpush3.bf16.xpose.msra.mxu0 %v1489_v45  ;;  %v1537_v50 = vsel %vm1454_vm0, %v1337_v41, 0  ;;  %v703_v52 = vadd.s32 %v3397_v4, %v573_v42  ;;  %v734_v55 = vadd.s32 %v3397_v4, %v604_v43  ;;  %v735_v56 = vadd.s32 %v3397_v4, %v605_v44 }
  0x26   : > { %3051 = vmatpush3.bf16.xpose.msra.mxu1 %v1537_v50  ;;  %vm830_vm9 = vcmp.lt.s32.totalorder %v702_v47, 1200  ;;  %v686_v58 = vadd.s32 %v3397_v4, %v556_v48  ;;  %v687_v59 = vadd.s32 %v3397_v4, %v557_v49  ;;  %v588_v60 = vadd.s32 352, %v3390_v3  ;;  %v457_v50 = vld [vmem:[%s3410_s23 + $0x150] sm:$0xff] }
  0x27   : > { %vm831_vm10 = vcmp.lt.s32.totalorder %v703_v52, 1200  ;;  %v1214_v61 = vsel %vm830_vm9, %v443_v46, 0.0  ;;  %vm862_vm11 = vcmp.lt.s32.totalorder %v734_v55, 1200  ;;  %vm863_vm12 = vcmp.lt.s32.totalorder %v735_v56, 1200  ;;  %v439_v55 = vld [vmem:[%s3410_s23 + $0xc0] sm:$0xff] }
  0x28   : > { %v1215_v63 = vsel %vm831_vm10, %v444_v51, 0.0  ;;  %v1246_v0 = vsel %vm862_vm11, %v475_v53, 0.0  ;;  %v1247_v1 = vsel %vm863_vm12, %v476_v54, 0.0  ;;  %vm814_vm13 = vcmp.lt.s32.totalorder %v686_v58, 1200  ;;  %v458_v51 = vld [vmem:[%s3410_s23 + $0x158] sm:$0xff] }
  0x29   : > { %v1328_v5 = vpack.c.bf16 %v1215_v63, %v1214_v61  ;;  %v1344_v6 = vpack.c.bf16 %v1247_v1, %v1246_v0  ;;  %vm815_vm14 = vcmp.lt.s32.totalorder %v687_v59, 1200  ;;  %v1198_v7 = vsel %vm814_vm13, %v427_v57, 0.0  ;;  %v440_v59 = vld [vmem:[%s3410_s23 + $0xc8] sm:$0xff] }
  0x2a   : > { %v1199_v8 = vsel %vm815_vm14, %v428_v62, 0.0  ;;  %v589_v10 = vadd.s32 360, %v3390_v3  ;;  %v718_v11 = vadd.s32 %v3397_v4, %v588_v60  ;;  %v570_v12 = vadd.s32 208, %v3390_v3 }
  0x2b   : > { %3123 = vmatprep.subr.msk.bf16.mxu0 %vm1454_vm0, %v1328_v5  ;;  %3131 = vmatprep.subr.msk.bf16.mxu1 %vm1454_vm0, %v1344_v6  ;;  %v1320_v13 = vpack.c.bf16 %v1199_v8, %v1198_v7  ;;  %v571_v14 = vadd.s32 216, %v3390_v3  ;;  %v602_v15 = vadd.s32 464, %v3390_v3  ;;  %v603_v16 = vadd.s32 472, %v3390_v3  ;;  %v471_v6 = vld [vmem:[%s3410_s23 + $0x1c0] sm:$0xff] }
  0x2c   : > { %v719_v18 = vadd.s32 %v3397_v4, %v589_v10  ;;  %vm846_vm15 = vcmp.lt.s32.totalorder %v718_v11, 1200  ;;  %v700_v20 = vadd.s32 %v3397_v4, %v570_v12  ;;  %v554_v21 = vadd.s32 80, %v3390_v3  ;;  %v423_v11 = vld [vmem:[%s3410_s23 + $0x40] sm:$0xff] }
  0x2d   : > { %v1486_v22 = vsel %vm1454_vm0, %v1320_v13, 0  ;;  %v1230_v23 = vsel %vm846_vm15, %v459_v9, 0.0  ;;  %v701_v25 = vadd.s32 %v3397_v4, %v571_v14  ;;  %v732_v27 = vadd.s32 %v3397_v4, %v602_v15  ;;  %v472_v9 = vld [vmem:[%s3410_s23 + $0x1c8] sm:$0xff] }
  0x2e   : > { %3029 = vmatpush3.bf16.xpose.msra.mxu0 %v1486_v22  ;;  %vm847_vm1 = vcmp.lt.s32.totalorder %v719_v18, 1200  ;;  %vm828_vm2 = vcmp.lt.s32.totalorder %v700_v20, 1200  ;;  %v733_v29 = vadd.s32 %v3397_v4, %v603_v16  ;;  %v555_v30 = vadd.s32 88, %v3390_v3  ;;  %v424_v18 = vld [vmem:[%s3410_s23 + $0x48] sm:$0xff]  ;;  %v455_v22 = vld [vmem:[%s3410_s23 + $0x140] sm:$0xff] }
  0x2f   : > { %v1231_v31 = vsel %vm847_vm1, %v460_v17, 0.0  ;;  %vm829_vm3 = vcmp.lt.s32.totalorder %v701_v25, 1200  ;;  %v1212_v32 = vsel %vm828_vm2, %v441_v19, 0.0  ;;  %vm860_vm4 = vcmp.lt.s32.totalorder %v732_v27, 1200 }
  0x30   : > { %v1336_v33 = vpack.c.bf16 %v1231_v31, %v1230_v23  ;;  %v1213_v34 = vsel %vm829_vm3, %v442_v24, 0.0  ;;  %vm861_vm5 = vcmp.lt.s32.totalorder %v733_v29, 1200  ;;  %v1244_v35 = vsel %vm860_vm4, %v473_v26, 0.0  ;;  %v456_v29 = vld [vmem:[%s3410_s23 + $0x148] sm:$0xff] }
  0x31   : > { %v1327_v36 = vpack.c.bf16 %v1213_v34, %v1212_v32  ;;  %v1245_v37 = vsel %vm861_vm5, %v474_v28, 0.0  ;;  %v684_v40 = vadd.s32 %v3397_v4, %v554_v21  ;;  %v685_v41 = vadd.s32 %v3397_v4, %v555_v30  ;;  %v437_v34 = vld [vmem:[%s3410_s23 + $0xb0] sm:$0xff] }
  0x32   : > { %v1534_v42 = vsel %vm1454_vm0, %v1336_v33, 0  ;;  %v1343_v43 = vpack.c.bf16 %v1245_v37, %v1244_v35  ;;  %v586_v44 = vadd.s32 336, %v3390_v3  ;;  %v587_v45 = vadd.s32 344, %v3390_v3  ;;  %v438_v35 = vld [vmem:[%s3410_s23 + $0xb8] sm:$0xff] }
  0x33   : > { %3053 = vmatpush3.bf16.xpose.msra.mxu1 %v1534_v42  ;;  %3124 = vmatprep.subr.msk.bf16.mxu0 %vm1454_vm0, %v1327_v36  ;;  %vm812_vm6 = vcmp.lt.s32.totalorder %v684_v40, 1200  ;;  %vm813_vm7 = vcmp.lt.s32.totalorder %v685_v41, 1200  ;;  %v568_v46 = vadd.s32 192, %v3390_v3  ;;  %v569_v47 = vadd.s32 200, %v3390_v3 }
  0x34   : > { %3132 = vmatprep.subr.msk.bf16.mxu1 %vm1454_vm0, %v1343_v43  ;;  %v1196_v48 = vsel %vm812_vm6, %v425_v38, 0.0  ;;  %v1197_v49 = vsel %vm813_vm7, %v426_v39, 0.0  ;;  %v716_v52 = vadd.s32 %v3397_v4, %v586_v44  ;;  %v717_v53 = vadd.s32 %v3397_v4, %v587_v45  ;;  %v469_v43 = vld [vmem:[%s3410_s23 + $0x1b0] sm:$0xff] }
  0x35   : > { %v1319_v54 = vpack.c.bf16 %v1197_v49, %v1196_v48  ;;  %v698_v56 = vadd.s32 %v3397_v4, %v568_v46  ;;  %v699_v57 = vadd.s32 %v3397_v4, %v569_v47  ;;  %v600_v58 = vadd.s32 448, %v3390_v3  ;;  %v470_v47 = vld [vmem:[%s3410_s23 + $0x1b8] sm:$0xff] }
  0x36   : > { %vm844_vm8 = vcmp.lt.s32.totalorder %v716_v52, 1200  ;;  %vm845_vm9 = vcmp.lt.s32.totalorder %v717_v53, 1200  ;;  %v601_v60 = vadd.s32 456, %v3390_v3  ;;  %v552_v61 = vadd.s32 64, %v3390_v3 }
  0x37   : > { %v1483_v62 = vsel %vm1454_vm0, %v1319_v54, 0  ;;  %v1228_v63 = vsel %vm844_vm8, %v457_v50, 0.0  ;;  %v1229_v0 = vsel %vm845_vm9, %v458_v51, 0.0  ;;  %vm826_vm10 = vcmp.lt.s32.totalorder %v698_v56, 1200  ;;  %v421_v50 = vld [vmem:[%s3410_s23 + $0x30] sm:$0xff] }
  0x38   : > { %3031 = vmatpush3.bf16.xpose.msra.mxu0 %v1483_v62  ;;  %v1335_v1 = vpack.c.bf16 %v1229_v0, %v1228_v63  ;;  %vm827_vm11 = vcmp.lt.s32.totalorder %v699_v57, 1200  ;;  %v1210_v5 = vsel %vm826_vm10, %v439_v55, 0.0  ;;  %v730_v7 = vadd.s32 %v3397_v4, %v600_v58  ;;  %v422_v57 = vld [vmem:[%s3410_s23 + $0x38] sm:$0xff]  ;;  %v453_v62 = vld [vmem:[%s3410_s23 + $0x130] sm:$0xff] }
  0x39   : > { %v1211_v8 = vsel %vm827_vm11, %v440_v59, 0.0  ;;  %v731_v10 = vadd.s32 %v3397_v4, %v601_v60  ;;  %v553_v12 = vadd.s32 72, %v3390_v3  ;;  %v682_v13 = vadd.s32 %v3397_v4, %v552_v61 }
  0x3a   : > { %v1531_v14 = vsel %vm1454_vm0, %v1335_v1, 0  ;;  %v1326_v15 = vpack.c.bf16 %v1211_v8, %v1210_v5  ;;  %vm858_vm12 = vcmp.lt.s32.totalorder %v730_v7, 1200  ;;  %v584_v16 = vadd.s32 320, %v3390_v3  ;;  %v454_v1 = vld [vmem:[%s3410_s23 + $0x138] sm:$0xff] }
  0x3b   : > { %3055 = vmatpush3.bf16.xpose.msra.mxu1 %v1531_v14  ;;  %vm859_vm13 = vcmp.lt.s32.totalorder %v731_v10, 1200  ;;  %v1242_v17 = vsel %vm858_vm12, %v471_v6, 0.0  ;;  %v683_v19 = vadd.s32 %v3397_v4, %v553_v12  ;;  %vm810_vm14 = vcmp.lt.s32.totalorder %v682_v13, 1200  ;;  %v436_v14 = vld [vmem:[%s3410_s23 + $0xa8] sm:$0xff] }
  0x3c   : > { %3125 = vmatprep.subr.msk.bf16.mxu0 %vm1454_vm0, %v1326_v15  ;;  %v1243_v20 = vsel %vm859_vm13, %v472_v9, 0.0  ;;  %v1194_v21 = vsel %vm810_vm14, %v423_v11, 0.0  ;;  %v585_v23 = vadd.s32 328, %v3390_v3  ;;  %v714_v24 = vadd.s32 %v3397_v4, %v584_v16  ;;  %v435_v9 = vld [vmem:[%s3410_s23 + $0xa0] sm:$0xff] }
  0x3d   : > { %v1342_v25 = vpack.c.bf16 %v1243_v20, %v1242_v17  ;;  %vm811_vm15 = vcmp.lt.s32.totalorder %v683_v19, 1200  ;;  %v566_v26 = vadd.s32 176, %v3390_v3  ;;  %v567_v27 = vadd.s32 184, %v3390_v3  ;;  %v467_v17 = vld [vmem:[%s3410_s23 + $0x1a0] sm:$0xff] }
  0x3e   : > { %v1195_v28 = vsel %vm811_vm15, %v424_v18, 0.0  ;;  %v715_v30 = vadd.s32 %v3397_v4, %v585_v23  ;;  %vm842_vm1 = vcmp.lt.s32.totalorder %v714_v24, 1200  ;;  %v598_v31 = vadd.s32 432, %v3390_v3  ;;  %v468_v18 = vld [vmem:[%s3410_s23 + $0x1a8] sm:$0xff] }
  0x3f   : > { %3133 = vmatprep.subr.msk.bf16.mxu1 %vm1454_vm0, %v1342_v25  ;;  %v1318_v32 = vpack.c.bf16 %v1195_v28, %v1194_v21  ;;  %v1226_v33 = vsel %vm842_vm1, %v455_v22, 0.0  ;;  %v696_v36 = vadd.s32 %v3397_v4, %v566_v26  ;;  %v697_v37 = vadd.s32 %v3397_v4, %v567_v27 }
  0x40   : > { %vm843_vm2 = vcmp.lt.s32.totalorder %v715_v30, 1200  ;;  %v599_v38 = vadd.s32 440, %v3390_v3  ;;  %v728_v39 = vadd.s32 %v3397_v4, %v598_v31  ;;  %v550_v40 = vadd.s32 48, %v3390_v3  ;;  %v419_v31 = vld [vmem:[%s3410_s23 + $0x20] sm:$0xff] }
  0x41   : > { %v1480_v41 = vsel %vm1454_vm0, %v1318_v32, 0  ;;  %v1227_v42 = vsel %vm843_vm2, %v456_v29, 0.0  ;;  %vm824_vm3 = vcmp.lt.s32.totalorder %v696_v36, 1200  ;;  %vm825_vm4 = vcmp.lt.s32.totalorder %v697_v37, 1200 }
  0x42   : > { %3033 = vmatpush3.bf16.xpose.msra.mxu0 %v1480_v41  ;;  %v1334_v44 = vpack.c.bf16 %v1227_v42, %v1226_v33  ;;  %v1208_v45 = vsel %vm824_vm3, %v437_v34, 0.0  ;;  %v1209_v46 = vsel %vm825_vm4, %v438_v35, 0.0  ;;  %v729_v48 = vadd.s32 %v3397_v4, %v599_v38  ;;  %v451_v41 = vld [vmem:[%s3410_s23 + $0x120] sm:$0xff] }
  0x43   : > { %v1325_v49 = vpack.c.bf16 %v1209_v46, %v1208_v45  ;;  %vm856_vm5 = vcmp.lt.s32.totalorder %v728_v39, 1200  ;;  %v551_v51 = vadd.s32 56, %v3390_v3  ;;  %v680_v52 = vadd.s32 %v3397_v4, %v550_v40  ;;  %v420_v39 = vld [vmem:[%s3410_s23 + $0x28] sm:$0xff] }
  0x44   : > { %v1528_v53 = vsel %vm1454_vm0, %v1334_v44, 0  ;;  %vm857_vm6 = vcmp.lt.s32.totalorder %v729_v48, 1200  ;;  %v1240_v54 = vsel %vm856_vm5, %v469_v43, 0.0  ;;  %v582_v55 = vadd.s32 304, %v3390_v3  ;;  %v452_v45 = vld [vmem:[%s3410_s23 + $0x128] sm:$0xff] }
  0x45   : > { %3057 = vmatpush3.bf16.xpose.msra.mxu1 %v1528_v53  ;;  %3126 = vmatprep.subr.msk.bf16.mxu0 %vm1454_vm0, %v1325_v49  ;;  %v1241_v56 = vsel %vm857_vm6, %v470_v47, 0.0  ;;  %v681_v58 = vadd.s32 %v3397_v4, %v551_v51  ;;  %vm808_vm7 = vcmp.lt.s32.totalorder %v680_v52, 1200  ;;  %v583_v59 = vadd.s32 312, %v3390_v3  ;;  %v433_v47 = vld [vmem:[%s3410_s23 + $0x90] sm:$0xff] }
  0x46   : > { %v1341_v60 = vpack.c.bf16 %v1241_v56, %v1240_v54  ;;  %v1192_v61 = vsel %vm808_vm7, %v421_v50, 0.0  ;;  %v712_v63 = vadd.s32 %v3397_v4, %v582_v55  ;;  %v564_v0 = vadd.s32 160, %v3390_v3  ;;  %v434_v50 = vld [vmem:[%s3410_s23 + $0x98] sm:$0xff]  ;;  %v465_v55 = vld [vmem:[%s3410_s23 + $0x190] sm:$0xff] }
  0x47   : > { %vm809_vm8 = vcmp.lt.s32.totalorder %v681_v58, 1200  ;;  %v713_v5 = vadd.s32 %v3397_v4, %v583_v59  ;;  %v565_v6 = vadd.s32 168, %v3390_v3  ;;  %v596_v7 = vadd.s32 416, %v3390_v3  ;;  %v466_v56 = vld [vmem:[%s3410_s23 + $0x198] sm:$0xff] }
  0x48   : > { %3134 = vmatprep.subr.msk.bf16.mxu1 %vm1454_vm0, %v1341_v60  ;;  %v1193_v8 = vsel %vm809_vm8, %v422_v57, 0.0  ;;  %vm840_vm9 = vcmp.lt.s32.totalorder %v712_v63, 1200  ;;  %v694_v10 = vadd.s32 %v3397_v4, %v564_v0  ;;  %v597_v11 = vadd.s32 424, %v3390_v3 }
  0x49   : > { %v1317_v12 = vpack.c.bf16 %v1193_v8, %v1192_v61  ;;  %vm841_vm10 = vcmp.lt.s32.totalorder %v713_v5, 1200  ;;  %v1224_v13 = vsel %vm840_vm9, %v453_v62, 0.0  ;;  %v695_v15 = vadd.s32 %v3397_v4, %v565_v6 }
  0x4a   : > { %v1225_v16 = vsel %vm841_vm10, %v454_v1, 0.0  ;;  %vm822_vm11 = vcmp.lt.s32.totalorder %v694_v10, 1200  ;;  %v726_v19 = vadd.s32 %v3397_v4, %v596_v7  ;;  %v727_v20 = vadd.s32 %v3397_v4, %v597_v11 }
  0x4b   : > { %v1477_v21 = vsel %vm1454_vm0, %v1317_v12, 0  ;;  %v1333_v22 = vpack.c.bf16 %v1225_v16, %v1224_v13  ;;  %vm823_vm12 = vcmp.lt.s32.totalorder %v695_v15, 1200  ;;  %v1206_v23 = vsel %vm822_vm11, %v435_v9, 0.0  ;;  %v417_v13 = vld [vmem:[%s3410_s23 + $0x10] sm:$0xff] }
  0x4c   : > { %3035 = vmatpush3.bf16.xpose.msra.mxu0 %v1477_v21  ;;  %v1207_v24 = vsel %vm823_vm12, %v436_v14, 0.0  ;;  %vm854_vm13 = vcmp.lt.s32.totalorder %v726_v19, 1200  ;;  %vm855_vm14 = vcmp.lt.s32.totalorder %v727_v20, 1200  ;;  %v548_v25 = vadd.s32 32, %v3390_v3  ;;  %v418_v14 = vld [vmem:[%s3410_s23 + $0x18] sm:$0xff]  ;;  %v449_v19 = vld [vmem:[%s3410_s23 + $0x110] sm:$0xff] }
  0x4d   : > { %v1525_v26 = vsel %vm1454_vm0, %v1333_v22, 0  ;;  %v1324_v27 = vpack.c.bf16 %v1207_v24, %v1206_v23  ;;  %v1238_v28 = vsel %vm854_vm13, %v467_v17, 0.0  ;;  %v1239_v29 = vsel %vm855_vm14, %v468_v18, 0.0  ;;  %v450_v20 = vld [vmem:[%s3410_s23 + $0x118] sm:$0xff] }
  0x4e   : > { %3059 = vmatpush3.bf16.xpose.msra.mxu1 %v1525_v26  ;;  %v1340_v30 = vpack.c.bf16 %v1239_v29, %v1238_v28  ;;  %v549_v32 = vadd.s32 40, %v3390_v3  ;;  %v678_v33 = vadd.s32 %v3397_v4, %v548_v25  ;;  %v580_v34 = vadd.s32 288, %v3390_v3  ;;  %v431_v25 = vld [vmem:[%s3410_s23 + $0x80] sm:$0xff] }
  0x4f   : > { %3127 = vmatprep.subr.msk.bf16.mxu0 %vm1454_vm0, %v1324_v27  ;;  %v581_v35 = vadd.s32 296, %v3390_v3  ;;  %v562_v36 = vadd.s32 144, %v3390_v3  ;;  %v563_v37 = vadd.s32 152, %v3390_v3  ;;  %v594_v38 = vadd.s32 400, %v3390_v3 }
  0x50   : > { %3135 = vmatprep.subr.msk.bf16.mxu1 %vm1454_vm0, %v1340_v30  ;;  %v679_v40 = vadd.s32 %v3397_v4, %v549_v32  ;;  %vm806_vm15 = vcmp.lt.s32.totalorder %v678_v33, 1200  ;;  %v710_v42 = vadd.s32 %v3397_v4, %v580_v34  ;;  %v595_v43 = vadd.s32 408, %v3390_v3  ;;  %v432_v30 = vld [vmem:[%s3410_s23 + $0x88] sm:$0xff] }
  0x51   : > { %v1190_v44 = vsel %vm806_vm15, %v419_v31, 0.0  ;;  %v711_v46 = vadd.s32 %v3397_v4, %v581_v35  ;;  %v692_v48 = vadd.s32 %v3397_v4, %v562_v36  ;;  %v693_v49 = vadd.s32 %v3397_v4, %v563_v37  ;;  %v463_v31 = vld [vmem:[%s3410_s23 + $0x180] sm:$0xff]  ;;  %v464_v35 = vld [vmem:[%s3410_s23 + $0x188] sm:$0xff] }
  0x52   : > { %vm807_vm1 = vcmp.lt.s32.totalorder %v679_v40, 1200  ;;  %vm838_vm2 = vcmp.lt.s32.totalorder %v710_v42, 1200  ;;  %v724_v51 = vadd.s32 %v3397_v4, %v594_v38  ;;  %v725_v52 = vadd.s32 %v3397_v4, %v595_v43 }
  0x53   : > { %v1191_v53 = vsel %vm807_vm1, %v420_v39, 0.0  ;;  %vm839_vm3 = vcmp.lt.s32.totalorder %v711_v46, 1200  ;;  %v1222_v54 = vsel %vm838_vm2, %v451_v41, 0.0  ;;  %vm820_vm4 = vcmp.lt.s32.totalorder %v692_v48, 1200  ;;  %v415_v46 = vld [vmem:[%s3410_s23] sm:$0xff] }
  0x54   : > { %v1316_v57 = vpack.c.bf16 %v1191_v53, %v1190_v44  ;;  %v1223_v58 = vsel %vm839_vm3, %v452_v45, 0.0  ;;  %vm821_vm5 = vcmp.lt.s32.totalorder %v693_v49, 1200  ;;  %v1204_v59 = vsel %vm820_vm4, %v433_v47, 0.0 }
  0x55   : > { %v1332_v60 = vpack.c.bf16 %v1223_v58, %v1222_v54  ;;  %v1205_v61 = vsel %vm821_vm5, %v434_v50, 0.0  ;;  %vm852_vm6 = vcmp.lt.s32.totalorder %v724_v51, 1200  ;;  %vm853_vm7 = vcmp.lt.s32.totalorder %v725_v52, 1200  ;;  %v416_v50 = vld [vmem:[%s3410_s23 + $0x8] sm:$0xff] }
  0x56   : > { %v1474_v62 = vsel %vm1454_vm0, %v1316_v57, 0  ;;  %v1323_v63 = vpack.c.bf16 %v1205_v61, %v1204_v59  ;;  %v1236_v0 = vsel %vm852_vm6, %v465_v55, 0.0  ;;  %v1237_v1 = vsel %vm853_vm7, %v466_v56, 0.0  ;;  %v447_v55 = vld [vmem:[%s3410_s23 + $0x100] sm:$0xff]  ;;  %v448_v56 = vld [vmem:[%s3410_s23 + $0x108] sm:$0xff]  ;;  %v509_v61 = vld [vmem:[%s3410_s23 + $0x2f0] sm:$0xff] }
  0x57   : > { %3037 = vmatpush3.bf16.xpose.msra.mxu0 %v1474_v62  ;;  %v1522_v5 = vsel %vm1454_vm0, %v1332_v60, 0  ;;  %v1339_v6 = vpack.c.bf16 %v1237_v1, %v1236_v0  ;;  %v546_v7 = vadd.s32 16, %v3390_v3  ;;  %v547_v8 = vadd.s32 24, %v3390_v3  ;;  %v510_v1 = vld [vmem:[%s3410_s23 + $0x2f8] sm:$0xff] }
  0x58   : > { %3061 = vmatpush3.bf16.xpose.msra.mxu1 %v1522_v5  ;;  %3128 = vmatprep.subr.msk.bf16.mxu0 %vm1454_vm0, %v1323_v63  ;;  %v578_v9 = vadd.s32 272, %v3390_v3  ;;  %v579_v10 = vadd.s32 280, %v3390_v3  ;;  %v560_v11 = vadd.s32 128, %v3390_v3  ;;  %v561_v12 = vadd.s32 136, %v3390_v3 }
  0x59   : > { %3136 = vmatprep.subr.msk.bf16.mxu1 %vm1454_vm0, %v1339_v6  ;;  %v676_v15 = vadd.s32 %v3397_v4, %v546_v7  ;;  %v677_v16 = vadd.s32 %v3397_v4, %v547_v8  ;;  %v592_v17 = vadd.s32 384, %v3390_v3  ;;  %v593_v18 = vadd.s32 392, %v3390_v3 }
  0x5a   : > { %v708_v21 = vadd.s32 %v3397_v4, %v578_v9  ;;  %v709_v22 = vadd.s32 %v3397_v4, %v579_v10  ;;  %v690_v23 = vadd.s32 %v3397_v4, %v560_v11  ;;  %v691_v24 = vadd.s32 %v3397_v4, %v561_v12  ;;  %v541_v9 = vld [vmem:[%s3410_s23 + $0x3f0] sm:$0xff]  ;;  %v542_v12 = vld [vmem:[%s3410_s23 + $0x3f8] sm:$0xff] }
  0x5b   : > { %vm804_vm8 = vcmp.lt.s32.totalorder %v676_v15, 1200  ;;  %vm805_vm9 = vcmp.lt.s32.totalorder %v677_v16, 1200  ;;  %v722_v26 = vadd.s32 %v3397_v4, %v592_v17  ;;  %v723_v27 = vadd.s32 %v3397_v4, %v593_v18 }
  0x5c   : > { %v1188_v28 = vsel %vm804_vm8, %v417_v13, 0.0  ;;  %v1189_v29 = vsel %vm805_vm9, %v418_v14, 0.0  ;;  %vm836_vm10 = vcmp.lt.s32.totalorder %v708_v21, 1200  ;;  %vm837_vm11 = vcmp.lt.s32.totalorder %v709_v22, 1200  ;;  %v493_v21 = vld [vmem:[%s3410_s23 + $0x270] sm:$0xff] }
  0x5d   : > { %v1315_v32 = vpack.c.bf16 %v1189_v29, %v1188_v28  ;;  %v1220_v33 = vsel %vm836_vm10, %v449_v19, 0.0  ;;  %v1221_v34 = vsel %vm837_vm11, %v450_v20, 0.0  ;;  %vm818_vm12 = vcmp.lt.s32.totalorder %v690_v23, 1200  ;;  %v494_v29 = vld [vmem:[%s3410_s23 + $0x278] sm:$0xff] }
  0x5e   : > { %v1331_v36 = vpack.c.bf16 %v1221_v34, %v1220_v33  ;;  %vm819_vm13 = vcmp.lt.s32.totalorder %v691_v24, 1200  ;;  %v1202_v37 = vsel %vm818_vm12, %v431_v25, 0.0  ;;  %vm850_vm14 = vcmp.lt.s32.totalorder %v722_v26, 1200 }
  0x5f   : > { %v1471_v38 = vsel %vm1454_vm0, %v1315_v32, 0  ;;  %v1203_v39 = vsel %vm819_vm13, %v432_v30, 0.0  ;;  %vm851_vm15 = vcmp.lt.s32.totalorder %v723_v27, 1200  ;;  %v1234_v40 = vsel %vm850_vm14, %v463_v31, 0.0  ;;  %v525_v31 = vld [vmem:[%s3410_s23 + $0x370] sm:$0xff] }
  0x60   : > { %3039 = vmatpush3.bf16.xpose.msra.mxu0 %v1471_v38  ;;  %v1519_v41 = vsel %vm1454_vm0, %v1331_v36, 0  ;;  %v1322_v42 = vpack.c.bf16 %v1203_v39, %v1202_v37  ;;  %v1235_v43 = vsel %vm851_vm15, %v464_v35, 0.0  ;;  %v545_v44 = vadd.s32 8, %v3390_v3  ;;  %v526_v35 = vld [vmem:[%s3410_s23 + $0x378] sm:$0xff]  ;;  %v3660_v37 = vld [vmem:[%s4339_s1 + $0x8] sm:$0xff]   ;;  %v507_v38 = vld [vmem:[%s3410_s23 + $0x2e0] sm:$0xff] }
  0x61   : > { %3063 = vmatpush3.bf16.xpose.msra.mxu1 %v1519_v41  ;;  %v1338_v45 = vpack.c.bf16 %v1235_v43, %v1234_v40  ;;  %v674_v47 = vadd.s32 %v3397_v4, %v3390_v3  ;;  %v576_v48 = vadd.s32 256, %v3390_v3  ;;  %v577_v49 = vadd.s32 264, %v3390_v3  ;;  %v508_v41 = vld [vmem:[%s3410_s23 + $0x2e8] sm:$0xff] }
  0x62   : > { %3129 = vmatprep.subr.msk.bf16.mxu0 %vm1454_vm0, %v1322_v42  ;;  %v675_v51 = vadd.s32 %v3397_v4, %v545_v44  ;;  %v638_v52 = vadd.s32 752, %v3390_v3  ;;  %v639_v53 = vadd.s32 760, %v3390_v3  ;;  %v670_v54 = vadd.s32 1008, %v3390_v3 }
  0x63   : > { %3137 = vmatprep.subr.msk.bf16.mxu1 %vm1454_vm0, %v1338_v45  ;;  %vm802_vm1 = vcmp.lt.s32.totalorder %v674_v47, 1200  ;;  %v706_v57 = vadd.s32 %v3397_v4, %v576_v48  ;;  %v707_v58 = vadd.s32 %v3397_v4, %v577_v49  ;;  %v671_v59 = vadd.s32 1016, %v3390_v3 }
  0x64   : > { %vm803_vm2 = vcmp.lt.s32.totalorder %v675_v51, 1200  ;;  %v1186_v60 = vsel %vm802_vm1, %v415_v46, 0.0  ;;  %v768_v62 = vadd.s32 %v3397_v4, %v638_v52  ;;  %v769_v63 = vadd.s32 %v3397_v4, %v639_v53  ;;  %v539_v46 = vld [vmem:[%s3410_s23 + $0x3e0] sm:$0xff]  ;;  %v540_v52 = vld [vmem:[%s3410_s23 + $0x3e8] sm:$0xff] }
  0x65   : > { %v1187_v0 = vsel %vm803_vm2, %v416_v50, 0.0  ;;  %vm834_vm3 = vcmp.lt.s32.totalorder %v706_v57, 1200  ;;  %vm835_vm4 = vcmp.lt.s32.totalorder %v707_v58, 1200  ;;  %v800_v5 = vadd.s32 %v3397_v4, %v670_v54 }
  0x66   : > { %v1314_v6 = vpack.c.bf16 %v1187_v0, %v1186_v60  ;;  %v1218_v7 = vsel %vm834_vm3, %v447_v55, 0.0  ;;  %v1219_v8 = vsel %vm835_vm4, %v448_v56, 0.0  ;;  %vm896_vm5 = vcmp.lt.s32.totalorder %v768_v62, 1200 }
  0x67   : > { %v1330_v10 = vpack.c.bf16 %v1219_v8, %v1218_v7  ;;  %vm897_vm6 = vcmp.lt.s32.totalorder %v769_v63, 1200  ;;  %v1280_v11 = vsel %vm896_vm5, %v509_v61, 0.0  ;;  %v801_v13 = vadd.s32 %v3397_v4, %v671_v59  ;;  %v491_v61 = vld [vmem:[%s3410_s23 + $0x260] sm:$0xff] }
  0x68   : > { %v1468_v14 = vsel %vm1454_vm0, %v1314_v6, 0  ;;  %v1281_v15 = vsel %vm897_vm6, %v510_v1, 0.0  ;;  %vm928_vm7 = vcmp.lt.s32.totalorder %v800_v5, 1200  ;;  %v622_v16 = vadd.s32 624, %v3390_v3  ;;  %v492_v5 = vld [vmem:[%s3410_s23 + $0x268] sm:$0xff]  ;;  %v523_v7 = vld [vmem:[%s3410_s23 + $0x360] sm:$0xff] }
  0x69   : > { %3041 = vmatpush3.bf16.xpose.msra.mxu0 %v1468_v14  ;;  %v1516_v17 = vsel %vm1454_vm0, %v1330_v10, 0  ;;  %v1361_v18 = vpack.c.bf16 %v1281_v15, %v1280_v11  ;;  %vm929_vm8 = vcmp.lt.s32.totalorder %v801_v13, 1200  ;;  %v1312_v19 = vsel %vm928_vm7, %v541_v9, 0.0  ;;  %v3696_v9 = vld [vmem:[%s4339_s1 + $0x10] sm:$0xff]   ;;  %v524_v11 = vld [vmem:[%s3410_s23 + $0x368] sm:$0xff] }
  0x6a   : > { %3065 = vmatpush3.bf16.xpose.msra.mxu1 %v1516_v17  ;;  %v1313_v20 = vsel %vm929_vm8, %v542_v12, 0.0  ;;  %v623_v22 = vadd.s32 632, %v3390_v3  ;;  %v752_v23 = vadd.s32 %v3397_v4, %v622_v16  ;;  %v654_v24 = vadd.s32 880, %v3390_v3  ;;  %v505_v13 = vld [vmem:[%s3410_s23 + $0x2d0] sm:$0xff]  ;;  %v506_v17 = vld [vmem:[%s3410_s23 + $0x2d8] sm:$0xff] }
  0x6b   : > { %3138 = vmatprep.subr.msk.bf16.mxu0 %vm1454_vm0, %v1361_v18  ;;  %v1377_v25 = vpack.c.bf16 %v1313_v20, %v1312_v19  ;;  %v655_v26 = vadd.s32 888, %v3390_v3  ;;  %v636_v27 = vadd.s32 736, %v3390_v3  ;;  %v637_v28 = vadd.s32 744, %v3390_v3 }
  0x6c   : > { %v753_v30 = vadd.s32 %v3397_v4, %v623_v22  ;;  %vm880_vm9 = vcmp.lt.s32.totalorder %v752_v23, 1200  ;;  %v784_v32 = vadd.s32 %v3397_v4, %v654_v24  ;;  %v668_v33 = vadd.s32 992, %v3390_v3 }
  0x6d   : > { %3146 = vmatprep.subr.msk.bf16.mxu1 %vm1454_vm0, %v1377_v25  ;;  %v1264_v34 = vsel %vm880_vm9, %v493_v21, 0.0  ;;  %v785_v36 = vadd.s32 %v3397_v4, %v655_v26  ;;  %v766_v39 = vadd.s32 %v3397_v4, %v636_v27  ;;  %v767_v40 = vadd.s32 %v3397_v4, %v637_v28  ;;  %v537_v26 = vld [vmem:[%s3410_s23 + $0x3d0] sm:$0xff] }
  0x6e   : > { %vm881_vm10 = vcmp.lt.s32.totalorder %v753_v30, 1200  ;;  %vm912_vm11 = vcmp.lt.s32.totalorder %v784_v32, 1200  ;;  %v669_v42 = vadd.s32 1000, %v3390_v3  ;;  %v798_v43 = vadd.s32 %v3397_v4, %v668_v33 }
  0x6f   : > { %v1265_v44 = vsel %vm881_vm10, %v494_v29, 0.0  ;;  %vm913_vm12 = vcmp.lt.s32.totalorder %v785_v36, 1200  ;;  %v1296_v45 = vsel %vm912_vm11, %v525_v31, 0.0  ;;  %vm894_vm13 = vcmp.lt.s32.totalorder %v766_v39, 1200  ;;  %v489_v39 = vld [vmem:[%s3410_s23 + $0x250] sm:$0xff] }
  0x70   : > { %3043 = vmatmul.mubr.msk.bf16.vlgmr.msra.gmra.mxu0 %vm1454_vm0, %v3387_v2  ;;  %v1353_v47 = vpack.c.bf16 %v1265_v44, %v1264_v34  ;;  %v1297_v48 = vsel %vm913_vm12, %v526_v35, 0.0  ;;  %vm895_vm14 = vcmp.lt.s32.totalorder %v767_v40, 1200  ;;  %v1278_v49 = vsel %vm894_vm13, %v507_v38, 0.0  ;;  %v538_v34 = vld [vmem:[%s3410_s23 + $0x3d8] sm:$0xff] }
  0x71   : > { %3067 = vmatmul.mubr.msk.bf16.vlgmr.msra.gmra.mxu1 %vm1454_vm0, %v3387_v2  ;;  %v1369_v50 = vpack.c.bf16 %v1297_v48, %v1296_v45  ;;  %3044 = vmatprep.mubr.msk.bf16.mxu0 %vm1454_vm0, %v3660_v37  ;;  %v1279_v51 = vsel %vm895_vm14, %v508_v41, 0.0  ;;  %v799_v53 = vadd.s32 %v3397_v4, %v669_v42  ;;  %vm926_vm15 = vcmp.lt.s32.totalorder %v798_v43, 1200  ;;  %v490_v40 = vld [vmem:[%s3410_s23 + $0x258] sm:$0xff]  ;;  %v521_v45 = vld [vmem:[%s3410_s23 + $0x350] sm:$0xff] }
  0x72   : > { %v1585_v54 = vsel %vm1454_vm0, %v1353_v47, 0  ;;  %3068 = vmatprep.mubr.msk.bf16.mxu1 %vm1454_vm0, %v3660_v37  ;;  %v1360_v55 = vpack.c.bf16 %v1279_v51, %v1278_v49  ;;  %v1310_v56 = vsel %vm926_vm15, %v539_v46, 0.0  ;;  %v620_v2 = vadd.s32 608, %v3390_v3  ;;  %v3734_v44 = vld [vmem:[%s4339_s1 + $0x18] sm:$0xff]  }
  0x73   : > { %3075 = vmatpush3.bf16.xpose.msra.mxu0 %v1585_v54  ;;  %v1633_v57 = vsel %vm1454_vm0, %v1369_v50, 0  ;;  %vm927_vm1 = vcmp.lt.s32.totalorder %v799_v53, 1200  ;;  %v621_v58 = vadd.s32 616, %v3390_v3  ;;  %v652_v59 = vadd.s32 864, %v3390_v3  ;;  %v522_v50 = vld [vmem:[%s3410_s23 + $0x358] sm:$0xff] }
  0x74   : > { %3099 = vmatpush3.bf16.xpose.msra.mxu1 %v1633_v57  ;;  %3139 = vmatprep.subr.msk.bf16.mxu0 %vm1454_vm0, %v1360_v55  ;;  %v1311_v60 = vsel %vm927_vm1, %v540_v52, 0.0  ;;  %v750_v62 = vadd.s32 %v3397_v4, %v620_v2  ;;  %v653_v63 = vadd.s32 872, %v3390_v3  ;;  %v634_v0 = vadd.s32 720, %v3390_v3  ;;  %v503_v2 = vld [vmem:[%s3410_s23 + $0x2c0] sm:$0xff] }
  0x75   : > { %v1376_v1 = vpack.c.bf16 %v1311_v60, %v1310_v56  ;;  %v751_v6 = vadd.s32 %v3397_v4, %v621_v58  ;;  %v782_v8 = vadd.s32 %v3397_v4, %v652_v59  ;;  %v635_v10 = vadd.s32 728, %v3390_v3  ;;  %v504_v59 = vld [vmem:[%s3410_s23 + $0x2c8] sm:$0xff] }
  0x76   : > { %vm878_vm2 = vcmp.lt.s32.totalorder %v750_v62, 1200  ;;  %v783_v12 = vadd.s32 %v3397_v4, %v653_v63  ;;  %v764_v14 = vadd.s32 %v3397_v4, %v634_v0  ;;  %v666_v15 = vadd.s32 976, %v3390_v3 }
  0x77   : > { %3147 = vmatprep.subr.msk.bf16.mxu1 %vm1454_vm0, %v1376_v1  ;;  %vm879_vm3 = vcmp.lt.s32.totalorder %v751_v6, 1200  ;;  %v1262_v16 = vsel %vm878_vm2, %v491_v61, 0.0  ;;  %vm910_vm4 = vcmp.lt.s32.totalorder %v782_v8, 1200  ;;  %v765_v18 = vadd.s32 %v3397_v4, %v635_v10  ;;  %v535_v6 = vld [vmem:[%s3410_s23 + $0x3c0] sm:$0xff] }
  0x78   : > { %3045 = vmatmul.mubr.msk.bf16.gmra.mxu0 %vm1454_vm0, %v3660_v37  ;;  %v1263_v19 = vsel %vm879_vm3, %v492_v5, 0.0  ;;  %vm911_vm5 = vcmp.lt.s32.totalorder %v783_v12, 1200  ;;  %v1294_v20 = vsel %vm910_vm4, %v523_v7, 0.0  ;;  %vm892_vm6 = vcmp.lt.s32.totalorder %v764_v14, 1200  ;;  %v536_v7 = vld [vmem:[%s3410_s23 + $0x3c8] sm:$0xff] }
  0x79   : > { %3069 = vmatmul.mubr.msk.bf16.gmra.mxu1 %vm1454_vm0, %v3660_v37  ;;  %v1352_v21 = vpack.c.bf16 %v1263_v19, %v1262_v16  ;;  %v1295_v22 = vsel %vm911_vm5, %v524_v11, 0.0  ;;  %3046 = vmatprep.mubr.msk.bf16.mxu0 %vm1454_vm0, %v3696_v9  ;;  %vm893_vm7 = vcmp.lt.s32.totalorder %v765_v18, 1200  ;;  %v1276_v23 = vsel %vm892_vm6, %v505_v13, 0.0  ;;  %v487_v13 = vld [vmem:[%s3410_s23 + $0x240] sm:$0xff] }
  0x7a   : > { %v1368_v24 = vpack.c.bf16 %v1295_v22, %v1294_v20  ;;  %3070 = vmatprep.mubr.msk.bf16.mxu1 %vm1454_vm0, %v3696_v9  ;;  %v1277_v25 = vsel %vm893_vm7, %v506_v17, 0.0  ;;  %v667_v27 = vadd.s32 984, %v3390_v3  ;;  %v796_v28 = vadd.s32 %v3397_v4, %v666_v15  ;;  %v488_v20 = vld [vmem:[%s3410_s23 + $0x248] sm:$0xff] }
  0x7b   : > { %v1582_v29 = vsel %vm1454_vm0, %v1352_v21, 0  ;;  %v1359_v30 = vpack.c.bf16 %v1277_v25, %v1276_v23  ;;  %v618_v31 = vadd.s32 592, %v3390_v3  ;;  %v619_v32 = vadd.s32 600, %v3390_v3 }
  0x7c   : > { %3077 = vmatpush3.bf16.xpose.msra.mxu0 %v1582_v29  ;;  %v1630_v33 = vsel %vm1454_vm0, %v1368_v24, 0  ;;  %v797_v35 = vadd.s32 %v3397_v4, %v667_v27  ;;  %vm924_vm8 = vcmp.lt.s32.totalorder %v796_v28, 1200  ;;  %v650_v36 = vadd.s32 848, %v3390_v3  ;;  %v519_v24 = vld [vmem:[%s3410_s23 + $0x340] sm:$0xff] }
  0x7d   : > { %3101 = vmatpush3.bf16.xpose.msra.mxu1 %v1630_v33  ;;  %3140 = vmatprep.subr.msk.bf16.mxu0 %vm1454_vm0, %v1359_v30  ;;  %v1308_v38 = vsel %vm924_vm8, %v537_v26, 0.0  ;;  %v748_v41 = vadd.s32 %v3397_v4, %v618_v31  ;;  %v749_v42 = vadd.s32 %v3397_v4, %v619_v32  ;;  %v651_v43 = vadd.s32 856, %v3390_v3  ;;  %v3784_v30 = vld [vmem:[%s4339_s1] sm:$0xff]   ;;  %v520_v32 = vld [vmem:[%s3410_s23 + $0x348] sm:$0xff] }
  0x7e   : > { %vm925_vm9 = vcmp.lt.s32.totalorder %v797_v35, 1200  ;;  %v780_v46 = vadd.s32 %v3397_v4, %v650_v36  ;;  %v632_v47 = vadd.s32 704, %v3390_v3  ;;  %v633_v48 = vadd.s32 712, %v3390_v3 }
  0x7f   : > { %v1309_v49 = vsel %vm925_vm9, %v538_v34, 0.0  ;;  %vm876_vm10 = vcmp.lt.s32.totalorder %v748_v41, 1200  ;;  %vm877_vm11 = vcmp.lt.s32.totalorder %v749_v42, 1200  ;;  %v781_v51 = vadd.s32 %v3397_v4, %v651_v43  ;;  %v533_v42 = vld [vmem:[%s3410_s23 + $0x3b0] sm:$0xff] }
  0x80   : > { %3047 = vmatmul.mubr.msk.bf16.gmra.mxu0 %vm1454_vm0, %v3696_v9  ;;  %v1375_v52 = vpack.c.bf16 %v1309_v49, %v1308_v38  ;;  %v1260_v53 = vsel %vm876_vm10, %v489_v39, 0.0  ;;  %v1261_v54 = vsel %vm877_vm11, %v490_v40, 0.0  ;;  %vm908_vm12 = vcmp.lt.s32.totalorder %v780_v46, 1200  ;;  %v501_v38 = vld [vmem:[%s3410_s23 + $0x2b0] sm:$0xff]  ;;  %v502_v39 = vld [vmem:[%s3410_s23 + $0x2b8] sm:$0xff] }
  0x81   : > { %3071 = vmatmul.mubr.msk.bf16.gmra.mxu1 %vm1454_vm0, %v3696_v9  ;;  %v1351_v55 = vpack.c.bf16 %v1261_v54, %v1260_v53  ;;  %vm909_vm13 = vcmp.lt.s32.totalorder %v781_v51, 1200  ;;  %v1292_v56 = vsel %vm908_vm12, %v521_v45, 0.0  ;;  %3048 = vmatprep.mubr.msk.bf16.mxu0 %vm1454_vm0, %v3734_v44  ;;  %v762_v57 = vadd.s32 %v3397_v4, %v632_v47  ;;  %v534_v49 = vld [vmem:[%s3410_s23 + $0x3b8] sm:$0xff] }
  0x82   : > { %3148 = vmatprep.subr.msk.bf16.mxu1 %vm1454_vm0, %v1375_v52  ;;  %v1293_v58 = vsel %vm909_vm13, %v522_v50, 0.0  ;;  %3072 = vmatprep.mubr.msk.bf16.mxu1 %vm1454_vm0, %v3734_v44  ;;  %v763_v60 = vadd.s32 %v3397_v4, %v633_v48  ;;  %v664_v61 = vadd.s32 960, %v3390_v3  ;;  %v665_v62 = vadd.s32 968, %v3390_v3 }
  0x83   : > { %v1579_v63 = vsel %vm1454_vm0, %v1351_v55, 0  ;;  %v1367_v0 = vpack.c.bf16 %v1293_v58, %v1292_v56  ;;  %vm890_vm14 = vcmp.lt.s32.totalorder %v762_v57, 1200  ;;  %v616_v1 = vadd.s32 576, %v3390_v3  ;;  %v485_v57 = vld [vmem:[%s3410_s23 + $0x230] sm:$0xff] }
  0x84   : > { %3079 = vmatpush3.bf16.xpose.msra.mxu0 %v1579_v63  ;;  %vm891_vm15 = vcmp.lt.s32.totalorder %v763_v60, 1200  ;;  %v1274_v5 = vsel %vm890_vm14, %v503_v2, 0.0  ;;  %v794_v8 = vadd.s32 %v3397_v4, %v664_v61  ;;  %v795_v10 = vadd.s32 %v3397_v4, %v665_v62  ;;  %v486_v61 = vld [vmem:[%s3410_s23 + $0x238] sm:$0xff] }
  0x85   : > { %v1627_v11 = vsel %vm1454_vm0, %v1367_v0, 0  ;;  %v1275_v12 = vsel %vm891_vm15, %v504_v59, 0.0  ;;  %v617_v14 = vadd.s32 584, %v3390_v3  ;;  %v746_v15 = vadd.s32 %v3397_v4, %v616_v1  ;;  %v517_v1 = vld [vmem:[%s3410_s23 + $0x330] sm:$0xff] }
  0x86   : > { %3103 = vmatpush3.bf16.xpose.msra.mxu1 %v1627_v11  ;;  %v1358_v16 = vpack.c.bf16 %v1275_v12, %v1274_v5  ;;  %vm922_vm1 = vcmp.lt.s32.totalorder %v794_v8, 1200  ;;  %vm923_vm2 = vcmp.lt.s32.totalorder %v795_v10, 1200  ;;  %v648_v17 = vadd.s32 832, %v3390_v3  ;;  %v518_v10 = vld [vmem:[%s3410_s23 + $0x338] sm:$0xff]  ;;  %v499_v12 = vld [vmem:[%s3410_s23 + $0x2a0] sm:$0xff] }
  0x87   : > { %v1306_v18 = vsel %vm922_vm1, %v535_v6, 0.0  ;;  %v1307_v19 = vsel %vm923_vm2, %v536_v7, 0.0  ;;  %v747_v21 = vadd.s32 %v3397_v4, %v617_v14  ;;  %vm874_vm3 = vcmp.lt.s32.totalorder %v746_v15, 1200  ;;  %v500_v15 = vld [vmem:[%s3410_s23 + $0x2a8] sm:$0xff] }
  0x88   : > { %3049 = vmatmul.mubr.msk.bf16.gmra.mxu0 %vm1454_vm0, %v3734_v44  ;;  %3141 = vmatprep.subr.msk.bf16.mxu0 %vm1454_vm0, %v1358_v16  ;;  %v1374_v22 = vpack.c.bf16 %v1307_v19, %v1306_v18  ;;  %v1258_v23 = vsel %vm874_vm3, %v487_v13, 0.0  ;;  %v649_v25 = vadd.s32 840, %v3390_v3  ;;  %v778_v26 = vadd.s32 %v3397_v4, %v648_v17 }
  0x89   : > { %3073 = vmatmul.mubr.msk.bf16.gmra.mxu1 %vm1454_vm0, %v3734_v44  ;;  %vm875_vm4 = vcmp.lt.s32.totalorder %v747_v21, 1200  ;;  %v630_v27 = vadd.s32 688, %v3390_v3  ;;  %v631_v28 = vadd.s32 696, %v3390_v3  ;;  %v662_v29 = vadd.s32 944, %v3390_v3  ;;  %3090 = vmatprep.mubr.msk.bf16.mxu0 %vm1454_vm0, %v3784_v30 }
  0x8a   : > { %3149 = vmatprep.subr.msk.bf16.mxu1 %vm1454_vm0, %v1374_v22  ;;  %v1259_v31 = vsel %vm875_vm4, %v488_v20, 0.0  ;;  %v779_v33 = vadd.s32 %v3397_v4, %v649_v25  ;;  %vm906_vm5 = vcmp.lt.s32.totalorder %v778_v26, 1200  ;;  %v663_v34 = vadd.s32 952, %v3390_v3  ;;  %3114 = vmatprep.mubr.msk.bf16.mxu1 %vm1454_vm0, %v3784_v30  ;;  %v531_v22 = vld [vmem:[%s3410_s23 + $0x3a0] sm:$0xff] }
  0x8b   : > { %v1350_v35 = vpack.c.bf16 %v1259_v31, %v1258_v23  ;;  %v1290_v36 = vsel %vm906_vm5, %v519_v24, 0.0  ;;  %v760_v40 = vadd.s32 %v3397_v4, %v630_v27  ;;  %v761_v41 = vadd.s32 %v3397_v4, %v631_v28  ;;  %v532_v27 = vld [vmem:[%s3410_s23 + $0x3a8] sm:$0xff] }
  0x8c   : > { %vm907_vm6 = vcmp.lt.s32.totalorder %v779_v33, 1200  ;;  %v792_v43 = vadd.s32 %v3397_v4, %v662_v29  ;;  %v793_v45 = vadd.s32 %v3397_v4, %v663_v34  ;;  %v614_v46 = vadd.s32 560, %v3390_v3 }
  0x8d   : > { %v1576_v47 = vsel %vm1454_vm0, %v1350_v35, 0  ;;  %v1291_v48 = vsel %vm907_vm6, %v520_v32, 0.0  ;;  %vm888_vm7 = vcmp.lt.s32.totalorder %v760_v40, 1200  ;;  %vm889_vm8 = vcmp.lt.s32.totalorder %v761_v41, 1200 }
  0x8e   : > { %3081 = vmatpush3.bf16.xpose.msra.mxu0 %v1576_v47  ;;  %v1366_v50 = vpack.c.bf16 %v1291_v48, %v1290_v36  ;;  %v1272_v51 = vsel %vm888_vm7, %v501_v38, 0.0  ;;  %v1273_v52 = vsel %vm889_vm8, %v502_v39, 0.0  ;;  %vm920_vm9 = vcmp.lt.s32.totalorder %v792_v43, 1200  ;;  %v483_v38 = vld [vmem:[%s3410_s23 + $0x220] sm:$0xff]  ;;  %v484_v39 = vld [vmem:[%s3410_s23 + $0x228] sm:$0xff] }
  0x8f   : > { %v1357_v53 = vpack.c.bf16 %v1273_v52, %v1272_v51  ;;  %vm921_vm10 = vcmp.lt.s32.totalorder %v793_v45, 1200  ;;  %v1304_v54 = vsel %vm920_vm9, %v533_v42, 0.0  ;;  %v615_v55 = vadd.s32 568, %v3390_v3  ;;  %v515_v45 = vld [vmem:[%s3410_s23 + $0x320] sm:$0xff] }
  0x90   : > { %v1624_v56 = vsel %vm1454_vm0, %v1366_v50, 0  ;;  %v1305_v2 = vsel %vm921_vm10, %v534_v49, 0.0  ;;  %v744_v58 = vadd.s32 %v3397_v4, %v614_v46  ;;  %v646_v59 = vadd.s32 816, %v3390_v3  ;;  %v516_v49 = vld [vmem:[%s3410_s23 + $0x328] sm:$0xff] }
  0x91   : > { %3105 = vmatpush3.bf16.xpose.msra.mxu1 %v1624_v56  ;;  %3142 = vmatprep.subr.msk.bf16.mxu0 %vm1454_vm0, %v1357_v53  ;;  %v1373_v60 = vpack.c.bf16 %v1305_v2, %v1304_v54  ;;  %v745_v62 = vadd.s32 %v3397_v4, %v615_v55  ;;  %v647_v63 = vadd.s32 824, %v3390_v3  ;;  %v628_v0 = vadd.s32 672, %v3390_v3  ;;  %v497_v54 = vld [vmem:[%s3410_s23 + $0x290] sm:$0xff] }
  0x92   : > { %vm872_vm11 = vcmp.lt.s32.totalorder %v744_v58, 1200  ;;  %v776_v5 = vadd.s32 %v3397_v4, %v646_v59  ;;  %v629_v6 = vadd.s32 680, %v3390_v3  ;;  %v660_v7 = vadd.s32 928, %v3390_v3 }
  0x93   : > { %3150 = vmatprep.subr.msk.bf16.mxu1 %vm1454_vm0, %v1373_v60  ;;  %vm873_vm12 = vcmp.lt.s32.totalorder %v745_v62, 1200  ;;  %v1256_v8 = vsel %vm872_vm11, %v485_v57, 0.0  ;;  %v777_v11 = vadd.s32 %v3397_v4, %v647_v63  ;;  %v758_v13 = vadd.s32 %v3397_v4, %v628_v0  ;;  %v498_v57 = vld [vmem:[%s3410_s23 + $0x298] sm:$0xff]  ;;  %v529_v60 = vld [vmem:[%s3410_s23 + $0x390] sm:$0xff] }
  0x94   : > { %v1257_v14 = vsel %vm873_vm12, %v486_v61, 0.0  ;;  %vm904_vm13 = vcmp.lt.s32.totalorder %v776_v5, 1200  ;;  %v759_v16 = vadd.s32 %v3397_v4, %v629_v6  ;;  %v661_v17 = vadd.s32 936, %v3390_v3  ;;  %v530_v6 = vld [vmem:[%s3410_s23 + $0x398] sm:$0xff] }
  0x95   : > { %v1349_v18 = vpack.c.bf16 %v1257_v14, %v1256_v8  ;;  %vm905_vm14 = vcmp.lt.s32.totalorder %v777_v11, 1200  ;;  %v1288_v19 = vsel %vm904_vm13, %v517_v1, 0.0  ;;  %vm886_vm15 = vcmp.lt.s32.totalorder %v758_v13, 1200  ;;  %v481_v14 = vld [vmem:[%s3410_s23 + $0x210] sm:$0xff] }
  0x96   : > { %v1289_v20 = vsel %vm905_vm14, %v518_v10, 0.0  ;;  %vm887_vm1 = vcmp.lt.s32.totalorder %v759_v16, 1200  ;;  %v1270_v21 = vsel %vm886_vm15, %v499_v12, 0.0  ;;  %v790_v23 = vadd.s32 %v3397_v4, %v660_v7 }
  0x97   : > { %v1573_v24 = vsel %vm1454_vm0, %v1349_v18, 0  ;;  %v1365_v25 = vpack.c.bf16 %v1289_v20, %v1288_v19  ;;  %v1271_v26 = vsel %vm887_vm1, %v500_v15, 0.0  ;;  %v791_v28 = vadd.s32 %v3397_v4, %v661_v17  ;;  %v482_v19 = vld [vmem:[%s3410_s23 + $0x218] sm:$0xff] }
  0x98   : > { %3083 = vmatpush3.bf16.xpose.msra.mxu0 %v1573_v24  ;;  %v1356_v29 = vpack.c.bf16 %v1271_v26, %v1270_v21  ;;  %vm918_vm2 = vcmp.lt.s32.totalorder %v790_v23, 1200  ;;  %v612_v31 = vadd.s32 544, %v3390_v3  ;;  %v613_v32 = vadd.s32 552, %v3390_v3  ;;  %v513_v24 = vld [vmem:[%s3410_s23 + $0x310] sm:$0xff] }
  0x99   : > { %v1621_v33 = vsel %vm1454_vm0, %v1365_v25, 0  ;;  %vm919_vm3 = vcmp.lt.s32.totalorder %v791_v28, 1200  ;;  %v1302_v34 = vsel %vm918_vm2, %v531_v22, 0.0  ;;  %v644_v35 = vadd.s32 800, %v3390_v3  ;;  %v514_v25 = vld [vmem:[%s3410_s23 + $0x318] sm:$0xff] }
  0x9a   : > { %3107 = vmatpush3.bf16.xpose.msra.mxu1 %v1621_v33  ;;  %3143 = vmatprep.subr.msk.bf16.mxu0 %vm1454_vm0, %v1356_v29  ;;  %v1303_v36 = vsel %vm919_vm3, %v532_v27, 0.0  ;;  %v742_v40 = vadd.s32 %v3397_v4, %v612_v31  ;;  %v743_v41 = vadd.s32 %v3397_v4, %v613_v32  ;;  %v645_v42 = vadd.s32 808, %v3390_v3  ;;  %v495_v29 = vld [vmem:[%s3410_s23 + $0x280] sm:$0xff] }
  0x9b   : > { %v1372_v43 = vpack.c.bf16 %v1303_v36, %v1302_v34  ;;  %v774_v46 = vadd.s32 %v3397_v4, %v644_v35  ;;  %v626_v47 = vadd.s32 656, %v3390_v3  ;;  %v627_v48 = vadd.s32 664, %v3390_v3  ;;  %v496_v34 = vld [vmem:[%s3410_s23 + $0x288] sm:$0xff] }
  0x9c   : > { %vm870_vm4 = vcmp.lt.s32.totalorder %v742_v40, 1200  ;;  %vm871_vm5 = vcmp.lt.s32.totalorder %v743_v41, 1200  ;;  %v775_v50 = vadd.s32 %v3397_v4, %v645_v42  ;;  %v658_v51 = vadd.s32 912, %v3390_v3 }
  0x9d   : > { %3151 = vmatprep.subr.msk.bf16.mxu1 %vm1454_vm0, %v1372_v43  ;;  %v1254_v52 = vsel %vm870_vm4, %v483_v38, 0.0  ;;  %v1255_v53 = vsel %vm871_vm5, %v484_v39, 0.0  ;;  %vm902_vm6 = vcmp.lt.s32.totalorder %v774_v46, 1200  ;;  %v756_v55 = vadd.s32 %v3397_v4, %v626_v47  ;;  %v1392_v43 = vld [vmem:[%s4340_s2 + $0x30] sm:$0xff]  ;;  %v527_v47 = vld [vmem:[%s3410_s23 + $0x380] sm:$0xff] }
  0x9e   : > { %v1348_v56 = vpack.c.bf16 %v1255_v53, %v1254_v52  ;;  %vm903_vm7 = vcmp.lt.s32.totalorder %v775_v50, 1200  ;;  %v1286_v2 = vsel %vm902_vm6, %v515_v45, 0.0  ;;  %v757_v58 = vadd.s32 %v3397_v4, %v627_v48 }
  0x9f   : > { %v1287_v59 = vsel %vm903_vm7, %v516_v49, 0.0  ;;  %vm884_vm8 = vcmp.lt.s32.totalorder %v756_v55, 1200  ;;  %v659_v61 = vadd.s32 920, %v3390_v3  ;;  %v788_v62 = vadd.s32 %v3397_v4, %v658_v51  ;;  %v528_v51 = vld [vmem:[%s3410_s23 + $0x388] sm:$0xff]  ;;  %v1390_v55 = vld [vmem:[%s4340_s2 + $0x20] sm:$0xff] }
  0xa0   : > { %v1570_v63 = vsel %vm1454_vm0, %v1348_v56, 0  ;;  %v1364_v0 = vpack.c.bf16 %v1287_v59, %v1286_v2  ;;  %vm885_vm9 = vcmp.lt.s32.totalorder %v757_v58, 1200  ;;  %v1268_v1 = vsel %vm884_vm8, %v497_v54, 0.0  ;;  %v479_v59 = vld [vmem:[%s3410_s23 + $0x200] sm:$0xff] }
  0xa1   : > { %3085 = vmatpush3.bf16.xpose.msra.mxu0 %v1570_v63  ;;  %v1269_v5 = vsel %vm885_vm9, %v498_v57, 0.0  ;;  %v789_v7 = vadd.s32 %v3397_v4, %v659_v61  ;;  %vm916_vm10 = vcmp.lt.s32.totalorder %v788_v62, 1200  ;;  %v610_v8 = vadd.s32 528, %v3390_v3  ;;  %v1393_v61 = vld [vmem:[%s4340_s2 + $0x38] sm:$0xff]  ;;  %v480_v63 = vld [vmem:[%s3410_s23 + $0x208] sm:$0xff] }
  0xa2   : > { %v1618_v10 = vsel %vm1454_vm0, %v1364_v0, 0  ;;  %v1355_v11 = vpack.c.bf16 %v1269_v5, %v1268_v1  ;;  %v1300_v12 = vsel %vm916_vm10, %v529_v60, 0.0  ;;  %v611_v13 = vadd.s32 536, %v3390_v3  ;;  %v511_v1 = vld [vmem:[%s3410_s23 + $0x300] sm:$0xff]  ;;  %v512_v5 = vld [vmem:[%s3410_s23 + $0x308] sm:$0xff] }
  0xa3   : > { %3109 = vmatpush3.bf16.xpose.msra.mxu1 %v1618_v10  ;;  %vm917_vm11 = vcmp.lt.s32.totalorder %v789_v7, 1200  ;;  %v740_v15 = vadd.s32 %v3397_v4, %v610_v8  ;;  %v642_v16 = vadd.s32 784, %v3390_v3  ;;  %v643_v17 = vadd.s32 792, %v3390_v3  ;;  %v1391_v10 = vld [vmem:[%s4340_s2 + $0x28] sm:$0xff] }
  0xa4   : > { %3144 = vmatprep.subr.msk.bf16.mxu0 %vm1454_vm0, %v1355_v11  ;;  %v1301_v18 = vsel %vm917_vm11, %v530_v6, 0.0  ;;  %v741_v20 = vadd.s32 %v3397_v4, %v611_v13  ;;  %v624_v21 = vadd.s32 640, %v3390_v3  ;;  %v625_v22 = vadd.s32 648, %v3390_v3 }
  0xa5   : > { %v1371_v23 = vpack.c.bf16 %v1301_v18, %v1300_v12  ;;  %vm868_vm12 = vcmp.lt.s32.totalorder %v740_v15, 1200  ;;  %v772_v26 = vadd.s32 %v3397_v4, %v642_v16  ;;  %v773_v27 = vadd.s32 %v3397_v4, %v643_v17  ;;  %v1389_v17 = vld [vmem:[%s4340_s2 + $0x18] sm:$0xff] }
  0xa6   : > { %vm869_vm13 = vcmp.lt.s32.totalorder %v741_v20, 1200  ;;  %v1252_v28 = vsel %vm868_vm12, %v481_v14, 0.0  ;;  %v754_v31 = vadd.s32 %v3397_v4, %v624_v21  ;;  %v755_v32 = vadd.s32 %v3397_v4, %v625_v22  ;;  %v1386_v20 = vld [vmem:[%s4340_s2] sm:$0xff]  ;;  %v1387_v21 = vld [vmem:[%s4340_s2 + $0x8] sm:$0xff]  ;;  %v2053_v22 = vld [vmem:[%s4342_s4 + $0x10] sm:$0xff] }
  0xa7   : > { %3152 = vmatprep.subr.msk.bf16.mxu1 %vm1454_vm0, %v1371_v23  ;;  %v1253_v33 = vsel %vm869_vm13, %v482_v19, 0.0  ;;  %vm900_vm14 = vcmp.lt.s32.totalorder %v772_v26, 1200  ;;  %vm901_vm15 = vcmp.lt.s32.totalorder %v773_v27, 1200  ;;  %v656_v35 = vadd.s32 896, %v3390_v3  ;;  %v2054_v23 = vld [vmem:[%s4342_s4 + $0x18] sm:$0xff]  ;;  %v2355_v26 = vld [vmem:[%s4344_s6 + $0x8] sm:$0xff] }
  0xa8   : > { %v1347_v36 = vpack.c.bf16 %v1253_v33, %v1252_v28  ;;  %v1284_v38 = vsel %vm900_vm14, %v513_v24, 0.0  ;;  %v1285_v39 = vsel %vm901_vm15, %v514_v25, 0.0  ;;  %vm882_vm1 = vcmp.lt.s32.totalorder %v754_v31, 1200  ;;  %v2051_v24 = vld [vmem:[%s4342_s4] sm:$0xff]  ;;  %v2052_v25 = vld [vmem:[%s4342_s4 + $0x8] sm:$0xff] }
  0xa9   : > { %v1363_v40 = vpack.c.bf16 %v1285_v39, %v1284_v38  ;;  %vm883_vm2 = vcmp.lt.s32.totalorder %v755_v32, 1200  ;;  %v1266_v41 = vsel %vm882_vm1, %v495_v29, 0.0  ;;  %v657_v42 = vadd.s32 904, %v3390_v3  ;;  %v2571_v27 = vld [vmem:[%s4346_s8] sm:$0xff] }
  0xaa   : > { %v1567_v45 = vsel %vm1454_vm0, %v1347_v36, 0  ;;  %v1267_v46 = vsel %vm883_vm2, %v496_v34, 0.0  ;;  %v786_v48 = vadd.s32 %v3397_v4, %v656_v35  ;;  %v3266_v53 = vmov 0   ;;  %v2753_v28 = vld [vmem:[%s4347_s9] sm:$0xff] }
  0xab   : > { %3087 = vmatpush3.bf16.xpose.msra.mxu0 %v1567_v45  ;;  %v1615_v49 = vsel %vm1454_vm0, %v1363_v40, 0  ;;  %v1354_v50 = vpack.c.bf16 %v1267_v46, %v1266_v41  ;;  %v787_v52 = vadd.s32 %v3397_v4, %v657_v42  ;;  %3194 = vset.pattern.permute.xlu0 %v3266_v53  ;;  %v608_v54 = vadd.s32 512, %v3390_v3  ;;  %v2815_v29 = vld [vmem:[#allocation2] sm:$0x1] }
  0xac   : > { %3111 = vmatpush3.bf16.xpose.msra.mxu1 %v1615_v49  ;;  %vm914_vm3 = vcmp.lt.s32.totalorder %v786_v48, 1200  ;;  %v609_v56 = vadd.s32 520, %v3390_v3  ;;  %v640_v2 = vadd.s32 768, %v3390_v3  ;;  %v641_v57 = vadd.s32 776, %v3390_v3  ;;  %1426 = vperm.xlu0 %3194, %v1392_v43  }
  0xad   : > { %3145 = vmatprep.subr.msk.bf16.mxu0 %vm1454_vm0, %v1354_v50  ;;  %vm915_vm4 = vcmp.lt.s32.totalorder %v787_v52, 1200  ;;  %v1298_v58 = vsel %vm914_vm3, %v527_v47, 0.0  ;;  %v738_v60 = vadd.s32 %v3397_v4, %v608_v54  ;;  %3195 = vset.pattern.permute.xlu1 %v3266_v53  ;;  %vm2085_vm9 = vcmask 523264  }
  0xae   : > { %v1299_v62 = vsel %vm915_vm4, %v528_v51, 0.0  ;;  %v739_v0 = vadd.s32 %v3397_v4, %v609_v56  ;;  %v770_v6 = vadd.s32 %v3397_v4, %v640_v2  ;;  %v771_v7 = vadd.s32 %v3397_v4, %v641_v57  ;;  %1416 = vperm.xlu1 %3195, %v1390_v55   ;;  %v1388_v4 = vld [vmem:[%s4340_s2 + $0x10] sm:$0xff] }
  0xaf   : > { %v1370_v8 = vpack.c.bf16 %v1299_v62, %v1298_v58  ;;  %vm866_vm5 = vcmp.lt.s32.totalorder %v738_v60, 1200 }
  0xb0   : > { %vm867_vm6 = vcmp.lt.s32.totalorder %v739_v0, 1200  ;;  %v1250_v11 = vsel %vm866_vm5, %v479_v59, 0.0  ;;  %vm898_vm7 = vcmp.lt.s32.totalorder %v770_v6, 1200  ;;  %vm899_vm8 = vcmp.lt.s32.totalorder %v771_v7, 1200  ;;  %1431 = vperm.xlu0 %3194, %v1393_v61  }
  0xb1   : > { %3153 = vmatprep.subr.msk.bf16.mxu1 %vm1454_vm0, %v1370_v8  ;;  %v1251_v12 = vsel %vm867_vm6, %v480_v63, 0.0  ;;  %v1282_v13 = vsel %vm898_vm7, %v511_v1, 0.0  ;;  %v1283_v14 = vsel %vm899_vm8, %v512_v5, 0.0 }
  0xb2   : > { %v1346_v15 = vpack.c.bf16 %v1251_v12, %v1250_v11  ;;  %v1362_v16 = vpack.c.bf16 %v1283_v14, %v1282_v13  ;;  %1421 = vperm.xlu1 %3195, %v1391_v10  }
  0xb4   : > { %v1564_v18 = vsel %vm1454_vm0, %v1346_v15, 0  ;;  %v1612_v19 = vsel %vm1454_vm0, %v1362_v16, 0  ;;  %1406 = vperm.xlu0 %3194, %v1388_v4  }
  0xb5   : > { %3089 = vmatpush3.bf16.xpose.msra.mxu0 %v1564_v18  ;;  %3113 = vmatpush3.bf16.xpose.msra.mxu1 %v1612_v19 }
  0xb6   : > { %1411 = vperm.xlu1 %3195, %v1389_v17  }
  0xb8   : > { %1396 = vperm.xlu0 %3194, %v1386_v20  }
  0xba   : > { %1401 = vperm.xlu1 %3195, %v1387_v21  }
  0xbc   : > { %3091 = vmatmul.mubr.msk.bf16.vlgmr.msra.gmra.mxu0 %vm1454_vm0, %v3784_v30  ;;  %3115 = vmatmul.mubr.msk.bf16.vlgmr.msra.gmra.mxu1 %vm1454_vm0, %v3784_v30  ;;  %v2354_v30 = vld [vmem:[%s4344_s6] sm:$0xff] }
  0xbd   : > { %3092 = vmatprep.mubr.msk.bf16.mxu0 %vm1454_vm0, %v3660_v37  ;;  %3116 = vmatprep.mubr.msk.bf16.mxu1 %vm1454_vm0, %v3660_v37 }
  0xbe   : > { %2067 = vperm.xlu0 %3194, %v2053_v22   ;;  %2072 = vperm.xlu1 %3195, %v2054_v23  }
  0xc2   : > { %2057 = vperm.xlu0 %3194, %v2051_v24   ;;  %2062 = vperm.xlu1 %3195, %v2052_v25  }
  0xc4   : > { %3093 = vmatmul.mubr.msk.bf16.gmra.mxu0 %vm1454_vm0, %v3660_v37  ;;  %3117 = vmatmul.mubr.msk.bf16.gmra.mxu1 %vm1454_vm0, %v3660_v37 }
  0xc5   : > { %3094 = vmatprep.mubr.msk.bf16.mxu0 %vm1454_vm0, %v3696_v9  ;;  %3118 = vmatprep.mubr.msk.bf16.mxu1 %vm1454_vm0, %v3696_v9 }
  0xc6   : > { %2358 = vperm.xlu0 %3194, %v2354_v30   ;;  %2363 = vperm.xlu1 %3195, %v2355_v26  }
  0xca   : > { %2574 = vperm.xlu0 %3194, %v2571_v27   ;;  %2756 = vperm.xlu1 %3195, %v2753_v28  }
  0xcc   : > { %3095 = vmatmul.mubr.msk.bf16.gmra.mxu0 %vm1454_vm0, %v3696_v9  ;;  %3119 = vmatmul.mubr.msk.bf16.gmra.mxu1 %vm1454_vm0, %v3696_v9 }
  0xcd   : > { %3096 = vmatprep.mubr.msk.bf16.mxu0 %vm1454_vm0, %v3734_v44  ;;  %3120 = vmatprep.mubr.msk.bf16.mxu1 %vm1454_vm0, %v3734_v44 }
  0xce   : > { %2818 = vperm.xlu0 %3194, %v2815_v29  }
  0xd4   : > { %3097 = vmatmul.mubr.msk.bf16.gmra.mxu0 %vm1454_vm0, %v3734_v44  ;;  %3121 = vmatmul.mubr.msk.bf16.gmra.mxu1 %vm1454_vm0, %v3734_v44 }
  0xd5   : > { %2124 = vmatprep.mubr.bf16.mxu0 %v3266_v53  ;;  %2177 = vmatprep.mubr.bf16.mxu1 %v3266_v53 }
 0x127   : > { %v4000_v38 = vpop.permute.xlu0 %1426 }
 0x129   : > { %v4002_v43 = vpop.permute.xlu1 %1416 }
 0x12b   : > { %v4004_v47 = vpop.permute.xlu0 %1431 }
 0x12d   : > { %v4006_v52 = vpop.permute.xlu1 %1421 }
 0x12f   : > { %v4008_v56 = vpop.permute.xlu0 %1406 }
 0x130   : > { %v3984_v37 = vpop.f32.mrf.mxu0 }
 0x131   : > { %v3986_v9 = vpop.f32.mrf.mxu1  ;;  %v4016_v62 = vpop.permute.xlu1 %1411 }
 0x132   : > { %v3988_v31 = vpop.f32.mrf.mxu0 }
 0x133   : > { %v3990_v32 = vpop.f32.mrf.mxu1 }
 0x134   : > { %v3992_v33 = vpop.f32.mrf.mxu0 }
 0x135   : > { %v3994_v34 = vpop.f32.mrf.mxu1 }
 0x136   : > { %v3996_v35 = vpop.f32.mrf.mxu0 }
 0x137   : > { %v3998_v36 = vpop.f32.mrf.mxu1 }
 0x138   : > { %v1703_v44 = vpop.f32.mrf.mxu0 }
 0x139   : > { %v1776_v39 = vpop.f32.mrf.mxu1  ;;  %v4014_v60 = vadd.f32 %v1703_v44, %v4008_v56 }
 0x13a   : > { %v1705_v40 = vpop.f32.mrf.mxu0  ;;  %v4019_v63 = vadd.f32 %v1776_v39, %v4008_v56 }
 0x13b   : > { %v1778_v41 = vpop.f32.mrf.mxu1  ;;  %v4011_v57 = vadd.f32 %v1705_v40, %v4008_v56 }
 0x13c   : > { %v1707_v42 = vpop.f32.mrf.mxu0  ;;  %v4022_v0 = vadd.f32 %v1778_v41, %v4008_v56 }
 0x13d   : > { %v1780_v45 = vpop.f32.mrf.mxu1  ;;  %v1968_v7 = vmax.f32 %v4011_v57, 0.0  ;;  %v4028_v8 = vadd.f32 %v1707_v42, %v4016_v62 }
 0x13e   : > { %v1709_v46 = vpop.f32.mrf.mxu0 }
 0x13f   : > { %v1782_v48 = vpop.f32.mrf.mxu1  ;;  %v1710_v13 = vadd.f32 %v1709_v46, %v4016_v62 }
 0x140   : > { %v1713_v49 = vpop.f32.mrf.mxu0  ;;  %v4034_v14 = vadd.f32 %v1782_v48, %v4016_v62 }
 0x141   : > { %v1786_v50 = vpop.f32.mrf.mxu1  ;;  %v1714_v17 = vadd.f32 %v1713_v49, %v4002_v43 }
 0x142   : > { %v1715_v51 = vpop.f32.mrf.mxu0  ;;  %v1787_v18 = vadd.f32 %v1786_v50, %v4002_v43 }
 0x143   : > { %v1788_v54 = vpop.f32.mrf.mxu1  ;;  %v1716_v1 = vadd.f32 %v1715_v51, %v4002_v43 }
 0x144   : > { %v1717_v55 = vpop.f32.mrf.mxu0  ;;  %v1789_v5 = vadd.f32 %v1788_v54, %v4002_v43  ;;  %v1781_v54 = vadd.f32 %v1780_v45, %v4016_v62 }
 0x145   : > { %v1790_v2 = vpop.f32.mrf.mxu1  ;;  %v1984_v22 = vmax.f32 %v1716_v1, 0.0  ;;  %v1718_v24 = vadd.f32 %v1717_v55, %v4006_v52  ;;  %v1976_v55 = vmax.f32 %v1710_v13, 0.0 }
 0x146   : > { %v1719_v58 = vpop.f32.mrf.mxu0  ;;  %v1986_v23 = vmax.f32 %v1789_v5, 0.0  ;;  %v1791_v26 = vadd.f32 %v1790_v2, %v4006_v52  ;;  %v1983_v2 = vmax.f32 %v1714_v17, 0.0 }
 0x147   : > { %v1792_v59 = vpop.f32.mrf.mxu1  ;;  %v1720_v10 = vadd.f32 %v1719_v58, %v4006_v52  ;;  %v1991_v1 = vmax.f32 %v1718_v24, 0.0 }
 0x148   : > { %v1723_v61 = vpop.f32.mrf.mxu0  ;;  %v1793_v19 = vadd.f32 %v1792_v59, %v4006_v52  ;;  %v4049_v59 = vpop.permute.xlu0 %1396 }
 0x149   : > { %v1796_v6 = vpop.f32.mrf.mxu1  ;;  %v1724_v11 = vadd.f32 %v1723_v61, %v4000_v38  ;;  %v1992_v27 = vmax.f32 %v1720_v10, 0.0  ;;  %v1985_v61 = vmax.f32 %v1787_v18, 0.0  ;;  %v1993_v10 = vmax.f32 %v1791_v26, 0.0 }
 0x14a   : > { %v1725_v12 = vpop.f32.mrf.mxu0  ;;  %v1797_v4 = vadd.f32 %v1796_v6, %v4000_v38  ;;  %v1994_v48 = vmax.f32 %v1793_v19, 0.0  ;;  %v1978_v19 = vmax.f32 %v4034_v14, 0.0  ;;  %v1696_v17 = vadd.f32 %v3988_v31, %v4049_v59 }
 0x14b   : > { %v1726_v15 = vadd.f32 %v1725_v12, %v4000_v38  ;;  %v1798_v16 = vpop.f32.mrf.mxu1  ;;  %v1999_v28 = vmax.f32 %v1724_v11, 0.0  ;;  %v2032_v11 = vpack.c.bf16 %v1992_v27, %v1984_v22  ;;  %v1975_v22 = vmax.f32 %v4028_v8, 0.0 }
 0x14c   : > { %v1799_v20 = vadd.f32 %v1798_v16, %v4000_v38  ;;  %v1727_v21 = vpop.f32.mrf.mxu0  ;;  %v2001_v39 = vmax.f32 %v1797_v4, 0.0  ;;  %v1970_v16 = vmax.f32 %v4022_v0, 0.0  ;;  %v2034_v45 = vpack.c.bf16 %v1994_v48, %v1986_v23 }
 0x14d   : > { %v1728_v25 = vadd.f32 %v1727_v21, %v4004_v47  ;;  %v1800_v30 = vpop.f32.mrf.mxu1  ;;  %v2000_v40 = vmax.f32 %v1726_v15, 0.0  ;;  %v4051_v15 = vpop.permute.xlu1 %1401  ;;  %v1967_v21 = vmax.f32 %v4014_v60, 0.0  ;;  %v2031_v24 = vpack.c.bf16 %v1991_v1, %v1983_v2 }
 0x14e   : > { %v1801_v29 = vadd.f32 %v1800_v30, %v4004_v47  ;;  %v1729_v44 = vpop.f32.mrf.mxu0  ;;  %v2002_v49 = vmax.f32 %v1799_v20, 0.0  ;;  %v1700_v18 = vadd.f32 %v3996_v35, %v4051_v15  ;;  %v1773_v20 = vadd.f32 %v3998_v36, %v4051_v15 }
 0x14f   : > { %v2007_v41 = vmax.f32 %v1728_v25, 0.0  ;;  %v1730_v42 = vadd.f32 %v1729_v44, %v4004_v47  ;;  %v1802_v46 = vpop.f32.mrf.mxu1  ;;  %v1969_v0 = vmax.f32 %v4019_v63, 0.0  ;;  %v1977_v14 = vmax.f32 %v1781_v54, 0.0 }
 0x150   : > { %v2009_v50 = vmax.f32 %v1801_v29, 0.0  ;;  %v1803_v51 = vadd.f32 %v1802_v46, %v4004_v47  ;;  %v2024_v31 = vpack.c.bf16 %v1976_v55, %v1968_v7  ;;  %v2033_v23 = vpack.c.bf16 %v1993_v10, %v1985_v61 }
 0x151   : > { %v2008_v58 = vmax.f32 %v1730_v42, 0.0  ;;  %v2039_v5 = vpack.c.bf16 %v2007_v41, %v1999_v28  ;;  %v1769_v35 = vadd.f32 %v3990_v32, %v4049_v59  ;;  %v1698_v36 = vadd.f32 %v3992_v33, %v4051_v15  ;;  %v4090_v41 = vld [vmem:[%s4341_s3 + $0x8] sm:$0xff]  }
 0x152   : > { %v2010_v6 = vmax.f32 %v1803_v51, 0.0  ;;  %v2041_v12 = vpack.c.bf16 %v2009_v50, %v2001_v39  ;;  %v2026_v60 = vpack.c.bf16 %v1978_v19, %v1970_v16  ;;  %v1771_v8 = vadd.f32 %v3994_v34, %v4051_v15 }
 0x153   : > { %v2040_v4 = vpack.c.bf16 %v2008_v58, %v2000_v40  ;;  %v1960_v25 = vmax.f32 %v1700_v18, 0.0  ;;  %v1694_v63 = vadd.f32 %v3984_v37, %v4049_v59  ;;  %v1962_v57 = vmax.f32 %v1773_v20, 0.0 }
 0x154   : > { %v2042_v13 = vpack.c.bf16 %v2010_v6, %v2002_v49  ;;  %v2023_v7 = vpack.c.bf16 %v1975_v22, %v1967_v21  ;;  %v1952_v30 = vmax.f32 %v1696_v17, 0.0  ;;  %v1767_v26 = vadd.f32 %v3986_v9, %v4049_v59  ;;  %v4079_v9 = vld [vmem:[%s4341_s3] sm:$0xff]  }
 0x155   : > { %2100 = vmatprep.subr.bf16.mxu0 %v2040_v4  ;;  %v2025_v32 = vpack.c.bf16 %v1977_v14, %v1969_v0  ;;  %v1954_v33 = vmax.f32 %v1769_v35, 0.0  ;;  %v1959_v27 = vmax.f32 %v1698_v36, 0.0  ;;  %v1961_v28 = vmax.f32 %v1771_v8, 0.0 }
 0x156   : > { %2153 = vmatprep.subr.bf16.mxu1 %v2042_v13  ;;  %2101 = vmatpush1.bf16.msra.mxu0 %v2039_v5  ;;  %v2016_v29 = vpack.c.bf16 %v1960_v25, %v1952_v30  ;;  %v1951_v34 = vmax.f32 %v1694_v63, 0.0  ;;  %v1953_v39 = vmax.f32 %v1767_v26, 0.0 }
 0x157   : > { %2154 = vmatpush1.bf16.msra.mxu1 %v2041_v12  ;;  %2102 = vmatprep.subr.bf16.mxu0 %v2032_v11  ;;  %v2018_v44 = vpack.c.bf16 %v1962_v57, %v1954_v33 }
 0x158   : > { %2155 = vmatprep.subr.bf16.mxu1 %v2034_v45  ;;  %v2015_v37 = vpack.c.bf16 %v1959_v27, %v1951_v34  ;;  %v2017_v40 = vpack.c.bf16 %v1961_v28, %v1953_v39 }
 0x15a   : > { %2103 = vmatpush1.bf16.msra.mxu0 %v2031_v24 }
 0x15b   : > { %2156 = vmatpush1.bf16.msra.mxu1 %v2033_v23  ;;  %2104 = vmatprep.subr.bf16.mxu0 %v2024_v31 }
 0x15c   : > { %2157 = vmatprep.subr.bf16.mxu1 %v2026_v60 }
 0x15e   : > { %2105 = vmatpush1.bf16.msra.mxu0 %v2023_v7 }
 0x15f   : > { %2158 = vmatpush1.bf16.msra.mxu1 %v2025_v32  ;;  %2106 = vmatprep.subr.bf16.mxu0 %v2016_v29 }
 0x160   : > { %2159 = vmatprep.subr.bf16.mxu1 %v2018_v44 }
 0x162   : > { %2107 = vmatpush1.bf16.msra.mxu0 %v2015_v37 }
 0x163   : > { %2160 = vmatpush1.bf16.msra.mxu1 %v2017_v40 }
 0x165   : > { %3001 = vmatmul.mubr.msk.bf16.vlgmr.msra.gmra.mxu0 %vm2085_vm9, %v4079_v9 }
 0x166   : > { %3003 = vmatmul.mubr.msk.bf16.vlgmr.msra.gmra.mxu1 %vm2085_vm9, %v4079_v9  ;;  %2134 = vmatprep.mubr.bf16.mxu0 %v3266_v53 }
 0x167   : > { %2187 = vmatprep.mubr.bf16.mxu1 %v3266_v53 }
 0x16d   : > { %3002 = vmatmul.mubr.msk.bf16.gmra.mxu0 %vm2085_vm9, %v4090_v41 }
 0x16e   : > { %3004 = vmatmul.mubr.msk.bf16.gmra.mxu1 %vm2085_vm9, %v4090_v41  ;;  %2230 = vmatprep.mubr.bf16.mxu0 %v3266_v53 }
 0x16f   : > { %2283 = vmatprep.mubr.bf16.mxu1 %v3266_v53 }
 0x17c   : > { %v4098_v42 = vpop.f32.mrf.mxu0  ;;  %v4100_v46 = vpop.f32.mrf.mxu1 }
 0x17e   : > { %v1841_v48 = vpop.f32.mrf.mxu0  ;;  %v1914_v49 = vpop.f32.mrf.mxu1 }
 0x17f   : > { %v4111_v22 = vadd.f32 %v1841_v48, %v4049_v59  ;;  %v4114_v24 = vadd.f32 %v1914_v49, %v4049_v59 }
 0x180   : > { %v4102_v50 = vpop.f32.mrf.mxu0  ;;  %v4104_v51 = vpop.f32.mrf.mxu1 }
 0x182   : > { %v1845_v54 = vpop.f32.mrf.mxu0  ;;  %v1918_v55 = vpop.f32.mrf.mxu1 }
 0x183   : > { %v4117_v0 = vadd.f32 %v1845_v54, %v4051_v15  ;;  %v4120_v14 = vadd.f32 %v1918_v55, %v4051_v15 }
 0x184   : > { %v4106_v2 = vpop.f32.mrf.mxu0  ;;  %v4108_v58 = vpop.f32.mrf.mxu1 }
 0x186   : > { %v1851_v61 = vpop.f32.mrf.mxu0  ;;  %v1924_v1 = vpop.f32.mrf.mxu1 }
 0x187   : > { %v4123_v35 = vadd.f32 %v1851_v61, %v4008_v56  ;;  %v4126_v36 = vadd.f32 %v1924_v1, %v4008_v56 }
 0x188   : > { %v1853_v5 = vpop.f32.mrf.mxu0  ;;  %v1926_v6 = vpop.f32.mrf.mxu1 }
 0x189   : > { %v4129_v60 = vadd.f32 %v1853_v5, %v4016_v62  ;;  %v4132_v8 = vadd.f32 %v1926_v6, %v4016_v62 }
 0x18a   : > { %v1855_v10 = vpop.f32.mrf.mxu0  ;;  %v1928_v11 = vpop.f32.mrf.mxu1 }
 0x18b   : > { %v4135_v25 = vadd.f32 %v1855_v10, %v4016_v62  ;;  %v4138_v63 = vadd.f32 %v1928_v11, %v4016_v62 }
 0x18c   : > { %v1859_v12 = vpop.f32.mrf.mxu0  ;;  %v1932_v4 = vpop.f32.mrf.mxu1 }
 0x18e   : > { %v1861_v16 = vpop.f32.mrf.mxu0  ;;  %v1934_v19 = vpop.f32.mrf.mxu1 }
 0x18f   : > { %v1862_v29 = vadd.f32 %v1861_v16, %v4002_v43  ;;  %v1935_v34 = vadd.f32 %v1934_v19, %v4002_v43  ;;  %v1933_v19 = vadd.f32 %v1932_v4, %v4002_v43 }
 0x190   : > { %v1863_v45 = vpop.f32.mrf.mxu0  ;;  %v1936_v13 = vpop.f32.mrf.mxu1 }
 0x191   : > { %v1864_v40 = vadd.f32 %v1863_v45, %v4006_v52  ;;  %v1937_v48 = vadd.f32 %v1936_v13, %v4006_v52 }
 0x192   : > { %v1865_v17 = vpop.f32.mrf.mxu0  ;;  %v1938_v18 = vpop.f32.mrf.mxu1 }
 0x193   : > { %v1866_v57 = vadd.f32 %v1865_v17, %v4006_v52  ;;  %v1939_v7 = vadd.f32 %v1938_v18, %v4006_v52  ;;  %v1988_v18 = vmax.f32 %v1862_v29, 0.0  ;;  %v1990_v52 = vmax.f32 %v1935_v34, 0.0 }
 0x194   : > { %v1869_v20 = vpop.f32.mrf.mxu0  ;;  %v1942_v21 = vpop.f32.mrf.mxu1  ;;  %v1964_v29 = vmax.f32 %v4117_v0, 0.0  ;;  %v1966_v34 = vmax.f32 %v4120_v14, 0.0 }
 0x195   : > { %v1870_v62 = vadd.f32 %v1869_v20, %v4000_v38  ;;  %v1943_v44 = vadd.f32 %v1942_v21, %v4000_v38  ;;  %v1996_v55 = vmax.f32 %v1866_v57, 0.0  ;;  %v1998_v61 = vmax.f32 %v1939_v7, 0.0 }
 0x196   : > { %v1871_v31 = vpop.f32.mrf.mxu0  ;;  %v1944_v23 = vpop.f32.mrf.mxu1  ;;  %v1995_v21 = vmax.f32 %v1864_v40, 0.0  ;;  %v1980_v57 = vmax.f32 %v4135_v25, 0.0  ;;  %v1982_v7 = vmax.f32 %v4138_v63, 0.0  ;;  %v1917_v25 = vadd.f32 %v4104_v51, %v4051_v15 }
 0x197   : > { %v1872_v32 = vadd.f32 %v1871_v31, %v4000_v38  ;;  %v1945_v33 = vadd.f32 %v1944_v23, %v4000_v38  ;;  %v1860_v38 = vadd.f32 %v1859_v12, %v4002_v43  ;;  %v2003_v17 = vmax.f32 %v1870_v62, 0.0 }
 0x198   : > { %v1873_v30 = vpop.f32.mrf.mxu0  ;;  %v1946_v26 = vpop.f32.mrf.mxu1  ;;  %v2005_v45 = vmax.f32 %v1943_v44, 0.0  ;;  %v1850_v43 = vadd.f32 %v4106_v2, %v4008_v56  ;;  %v1923_v12 = vadd.f32 %v4108_v58, %v4008_v56  ;;  %v1972_v63 = vmax.f32 %v4123_v35, 0.0 }
 0x199   : > { %v1874_v27 = vadd.f32 %v1873_v30, %v4004_v47  ;;  %v1947_v28 = vadd.f32 %v1946_v26, %v4004_v47  ;;  %v2004_v6 = vmax.f32 %v1872_v32, 0.0  ;;  %v2006_v10 = vmax.f32 %v1945_v33, 0.0 }
 0x19a   : > { %v1875_v39 = vpop.f32.mrf.mxu0  ;;  %v1948_v37 = vpop.f32.mrf.mxu1  ;;  %v2036_v30 = vpack.c.bf16 %v1996_v55, %v1988_v18  ;;  %v2038_v26 = vpack.c.bf16 %v1998_v61, %v1990_v52  ;;  %v1987_v4 = vmax.f32 %v1860_v38, 0.0  ;;  %v1989_v32 = vmax.f32 %v1933_v19, 0.0 }
 0x19b   : > { %v1876_v49 = vadd.f32 %v1875_v39, %v4004_v47  ;;  %v1949_v54 = vadd.f32 %v1948_v37, %v4004_v47  ;;  %v2011_v1 = vmax.f32 %v1874_v27, 0.0  ;;  %v2013_v5 = vmax.f32 %v1947_v28, 0.0 }
 0x19c   : > { %v1997_v47 = vmax.f32 %v1937_v48, 0.0  ;;  %v1844_v33 = vadd.f32 %v4102_v50, %v4051_v15  ;;  %v1974_v27 = vmax.f32 %v4126_v36, 0.0  ;;  %v1979_v2 = vmax.f32 %v4129_v60, 0.0 }
 0x19d   : > { %v2012_v11 = vmax.f32 %v1876_v49, 0.0  ;;  %v2014_v16 = vmax.f32 %v1949_v54, 0.0  ;;  %v2043_v31 = vpack.c.bf16 %v2011_v1, %v2003_v17  ;;  %v2045_v23 = vpack.c.bf16 %v2013_v5, %v2005_v45  ;;  %v4192_v1 = vpop.permute.xlu1 %2072 }
 0x19e   : > { %v1981_v56 = vmax.f32 %v4132_v8, 0.0  ;;  %v2035_v58 = vpack.c.bf16 %v1995_v21, %v1987_v4  ;;  %v2037_v28 = vpack.c.bf16 %v1997_v47, %v1989_v32  ;;  %v2028_v50 = vpack.c.bf16 %v1980_v57, %v1972_v63 }
 0x19f   : > { %v2044_v13 = vpack.c.bf16 %v2012_v11, %v2004_v6  ;;  %v2046_v20 = vpack.c.bf16 %v2014_v16, %v2006_v10  ;;  %v2030_v62 = vpack.c.bf16 %v1982_v7, %v1974_v27  ;;  %v1840_v15 = vadd.f32 %v4098_v42, %v4049_v59 }
 0x1a0   : > { %v1913_v51 = vadd.f32 %v4100_v46, %v4049_v59  ;;  %v1971_v35 = vmax.f32 %v1850_v43, 0.0  ;;  %v1973_v36 = vmax.f32 %v1923_v12, 0.0  ;;  %v1956_v60 = vmax.f32 %v4111_v22, 0.0 }
 0x1a1   : > { %2206 = vmatprep.subr.bf16.mxu0 %v2044_v13  ;;  %2259 = vmatprep.subr.bf16.mxu1 %v2046_v20  ;;  %v1958_v8 = vmax.f32 %v4114_v24, 0.0  ;;  %v1963_v0 = vmax.f32 %v1844_v33, 0.0  ;;  %v1965_v14 = vmax.f32 %v1917_v25, 0.0  ;;  %v1955_v42 = vmax.f32 %v1840_v15, 0.0  ;;  %v4196_v19 = vpop.permute.xlu1 %2062 }
 0x1a2   : > { %2207 = vmatpush1.bf16.msra.mxu0 %v2043_v31  ;;  %2260 = vmatpush1.bf16.msra.mxu1 %v2045_v23  ;;  %v2027_v44 = vpack.c.bf16 %v1979_v2, %v1971_v35  ;;  %v2029_v39 = vpack.c.bf16 %v1981_v56, %v1973_v36  ;;  %v2020_v37 = vpack.c.bf16 %v1964_v29, %v1956_v60  ;;  %v1957_v48 = vmax.f32 %v1913_v51, 0.0 }
 0x1a3   : > { %2208 = vmatprep.subr.bf16.mxu0 %v2036_v30  ;;  %2261 = vmatprep.subr.bf16.mxu1 %v2038_v26  ;;  %v2022_v40 = vpack.c.bf16 %v1966_v34, %v1958_v8  ;;  %v2019_v59 = vpack.c.bf16 %v1963_v0, %v1955_v42 }
 0x1a4   : > { %v2021_v46 = vpack.c.bf16 %v1965_v14, %v1957_v48 }
 0x1a6   : > { %2209 = vmatpush1.bf16.msra.mxu0 %v2035_v58  ;;  %2262 = vmatpush1.bf16.msra.mxu1 %v2037_v28 }
 0x1a7   : > { %2210 = vmatprep.subr.bf16.mxu0 %v2028_v50  ;;  %2263 = vmatprep.subr.bf16.mxu1 %v2030_v62 }
 0x1aa   : > { %2211 = vmatpush1.bf16.msra.mxu0 %v2027_v44  ;;  %2264 = vmatpush1.bf16.msra.mxu1 %v2029_v39 }
 0x1ab   : > { %2212 = vmatprep.subr.bf16.mxu0 %v2020_v37  ;;  %2265 = vmatprep.subr.bf16.mxu1 %v2022_v40 }
 0x1ae   : > { %2213 = vmatpush1.bf16.msra.mxu0 %v2019_v59  ;;  %2266 = vmatpush1.bf16.msra.mxu1 %v2021_v46  ;;  %v4217_v59 = vld [vmem:[%s4343_s5] sm:$0xff]  }
 0x1b1   : > { %3005 = vmatmul.mubr.msk.bf16.vlgmr.msra.gmra.mxu0 %vm2085_vm9, %v4079_v9  ;;  %3007 = vmatmul.mubr.msk.bf16.vlgmr.msra.gmra.mxu1 %vm2085_vm9, %v4079_v9  ;;  %v4190_v9 = vpop.permute.xlu0 %2067 }
 0x1b2   : > { %2240 = vmatprep.mubr.bf16.mxu0 %v3266_v53  ;;  %2293 = vmatprep.mubr.bf16.mxu1 %v3266_v53 }
 0x1b9   : > { %3006 = vmatmul.mubr.msk.bf16.gmra.mxu0 %vm2085_vm9, %v4090_v41  ;;  %3008 = vmatmul.mubr.msk.bf16.gmra.mxu1 %vm2085_vm9, %v4090_v41  ;;  %v4194_v41 = vpop.permute.xlu0 %2057 }
 0x1ba   : > { %2406 = vmatprep.mubr.bf16.mxu0 %v3266_v53  ;;  %2449 = vmatprep.mubr.bf16.mxu1 %v3266_v53 }
 0x225   : > { %v2126_v22 = vpop.f32.mrf.mxu0 }
 0x226   : > { %v2179_v24 = vpop.f32.mrf.mxu1  ;;  %v2127_v45 = vadd.f32 %v2126_v22, %v4194_v41 }
 0x227   : > { %v2128_v49 = vpop.f32.mrf.mxu0  ;;  %v2180_v50 = vadd.f32 %v2179_v24, %v4194_v41 }
 0x228   : > { %v2181_v54 = vpop.f32.mrf.mxu1  ;;  %v2129_v7 = vadd.f32 %v2128_v49, %v4194_v41  ;;  %v2304_v39 = vmax.f32 %v2127_v45, 0.0 }
 0x229   : > { %v2130_v55 = vpop.f32.mrf.mxu0  ;;  %v2182_v30 = vadd.f32 %v2181_v54, %v4194_v41  ;;  %v2306_v40 = vmax.f32 %v2180_v50, 0.0 }
 0x22a   : > { %v2183_v61 = vpop.f32.mrf.mxu1  ;;  %v2131_v4 = vadd.f32 %v2130_v55, %v4196_v19  ;;  %v2305_v62 = vmax.f32 %v2129_v7, 0.0 }
 0x22b   : > { %v2132_v5 = vpop.f32.mrf.mxu0  ;;  %v2184_v32 = vadd.f32 %v2183_v61, %v4196_v19  ;;  %v2307_v35 = vmax.f32 %v2182_v30, 0.0 }
 0x22c   : > { %v2185_v6 = vpop.f32.mrf.mxu1  ;;  %v2133_v18 = vadd.f32 %v2132_v5, %v4196_v19  ;;  %v2312_v36 = vmax.f32 %v2131_v4, 0.0 }
 0x22d   : > { %v2136_v10 = vpop.f32.mrf.mxu0  ;;  %v2186_v21 = vadd.f32 %v2185_v6, %v4196_v19  ;;  %v2314_v0 = vmax.f32 %v2184_v32, 0.0 }
 0x22e   : > { %v2189_v11 = vpop.f32.mrf.mxu1  ;;  %v2137_v47 = vadd.f32 %v2136_v10, %v4190_v9  ;;  %v2313_v63 = vmax.f32 %v2133_v18, 0.0  ;;  %v2336_v42 = vpack.c.bf16 %v2312_v36, %v2304_v39 }
 0x22f   : > { %v2138_v16 = vpop.f32.mrf.mxu0  ;;  %v2190_v26 = vadd.f32 %v2189_v11, %v4190_v9  ;;  %v2315_v58 = vmax.f32 %v2186_v21, 0.0  ;;  %v2338_v48 = vpack.c.bf16 %v2314_v0, %v2306_v40 }
 0x230   : > { %v2191_v38 = vpop.f32.mrf.mxu1  ;;  %v2139_v52 = vadd.f32 %v2138_v16, %v4190_v9  ;;  %v2320_v28 = vmax.f32 %v2137_v47, 0.0  ;;  %v2337_v14 = vpack.c.bf16 %v2313_v63, %v2305_v62 }
 0x231   : > { %v2140_v17 = vpop.f32.mrf.mxu0  ;;  %v2192_v31 = vadd.f32 %v2191_v38, %v4190_v9  ;;  %v2322_v15 = vmax.f32 %v2190_v26, 0.0  ;;  %v2339_v37 = vpack.c.bf16 %v2315_v58, %v2307_v35 }
 0x232   : > { %v2141_v13 = vadd.f32 %v2140_v17, %v4192_v1  ;;  %v2193_v20 = vpop.f32.mrf.mxu1  ;;  %v2321_v27 = vmax.f32 %v2139_v52, 0.0 }
 0x233   : > { %v2194_v23 = vadd.f32 %v2193_v20, %v4192_v1  ;;  %v2142_v57 = vpop.f32.mrf.mxu0  ;;  %v2323_v29 = vmax.f32 %v2192_v31, 0.0 }
 0x234   : > { %v2143_v43 = vadd.f32 %v2142_v57, %v4192_v1  ;;  %v2195_v12 = vpop.f32.mrf.mxu1  ;;  %v2328_v33 = vmax.f32 %v2141_v13, 0.0 }
 0x235   : > { %v2196_v25 = vadd.f32 %v2195_v12, %v4192_v1  ;;  %v2330_v2 = vmax.f32 %v2194_v23, 0.0 }
 0x236   : > { %v2329_v56 = vmax.f32 %v2143_v43, 0.0  ;;  %v2344_v60 = vpack.c.bf16 %v2328_v33, %v2320_v28 }
 0x237   : > { %v2331_v34 = vmax.f32 %v2196_v25, 0.0  ;;  %v2346_v44 = vpack.c.bf16 %v2330_v2, %v2322_v15 }
 0x238   : > { %v2345_v51 = vpack.c.bf16 %v2329_v56, %v2321_v27 }
 0x239   : > { %v2347_v8 = vpack.c.bf16 %v2331_v34, %v2323_v29 }
 0x23a   : > { %2386 = vmatprep.subr.bf16.mxu0 %v2345_v51 }
 0x23b   : > { %2429 = vmatprep.subr.bf16.mxu1 %v2347_v8  ;;  %2387 = vmatpush1.bf16.msra.mxu0 %v2344_v60 }
 0x23c   : > { %2430 = vmatpush1.bf16.msra.mxu1 %v2346_v44  ;;  %2388 = vmatprep.subr.bf16.mxu0 %v2337_v14 }
 0x23d   : > { %2431 = vmatprep.subr.bf16.mxu1 %v2339_v37 }
 0x23f   : > { %2389 = vmatpush1.bf16.msra.mxu0 %v2336_v42  ;;  %v2359_v42 = vpop.permute.xlu0 %2358 }
 0x240   : > { %2432 = vmatpush1.bf16.msra.mxu1 %v2338_v48 }
 0x242   : > { %3010 = vmatmul.mubr.msk.bf16.vlgmr.msra.gmra.mxu0 %vm1454_vm0, %v4217_v59 }
 0x243   : > { %3011 = vmatmul.mubr.msk.bf16.vlgmr.msra.gmra.mxu1 %vm1454_vm0, %v4217_v59  ;;  %2492 = vmatprep.mubr.bf16.mxu0 %v3266_v53 }
 0x244   : > { %2535 = vmatprep.mubr.bf16.mxu1 %v3266_v53 }
 0x271   : > { %v2232_v46 = vpop.f32.mrf.mxu0  ;;  %v2285_v22 = vpop.f32.mrf.mxu1 }
 0x272   : > { %v2286_v28 = vadd.f32 %v2285_v22, %v4194_v41 }
 0x273   : > { %v2234_v24 = vpop.f32.mrf.mxu0  ;;  %v2287_v49 = vpop.f32.mrf.mxu1 }
 0x274   : > { %v2235_v47 = vadd.f32 %v2234_v24, %v4194_v41  ;;  %v2288_v31 = vadd.f32 %v2287_v49, %v4194_v41  ;;  %v2310_v14 = vmax.f32 %v2286_v28, 0.0 }
 0x275   : > { %v2236_v54 = vpop.f32.mrf.mxu0  ;;  %v2289_v55 = vpop.f32.mrf.mxu1 }
 0x276   : > { %v2237_v26 = vadd.f32 %v2236_v54, %v4196_v19  ;;  %v2290_v43 = vadd.f32 %v2289_v55, %v4196_v19  ;;  %v2309_v50 = vmax.f32 %v2235_v47, 0.0 }
 0x277   : > { %v2238_v61 = vpop.f32.mrf.mxu0  ;;  %v2291_v5 = vpop.f32.mrf.mxu1 }
 0x278   : > { %v2239_v38 = vadd.f32 %v2238_v61, %v4196_v19  ;;  %v2292_v17 = vadd.f32 %v2291_v5, %v4196_v19  ;;  %v2311_v19 = vmax.f32 %v2288_v31, 0.0  ;;  %v2316_v51 = vmax.f32 %v2237_v26, 0.0 }
 0x279   : > { %v2242_v6 = vpop.f32.mrf.mxu0  ;;  %v2295_v10 = vpop.f32.mrf.mxu1 }
 0x27a   : > { %v2243_v23 = vadd.f32 %v2242_v6, %v4190_v9  ;;  %v2296_v57 = vadd.f32 %v2295_v10, %v4190_v9  ;;  %v2317_v32 = vmax.f32 %v2239_v38, 0.0  ;;  %v2319_v33 = vmax.f32 %v2292_v17, 0.0 }
 0x27b   : > { %v2244_v11 = vpop.f32.mrf.mxu0  ;;  %v2297_v16 = vpop.f32.mrf.mxu1 }
 0x27c   : > { %v2245_v52 = vadd.f32 %v2244_v11, %v4190_v9  ;;  %v2298_v13 = vadd.f32 %v2297_v16, %v4190_v9  ;;  %v2233_v9 = vadd.f32 %v2232_v46, %v4194_v41  ;;  %v2324_v29 = vmax.f32 %v2243_v23, 0.0  ;;  %v2364_v46 = vpop.permute.xlu1 %2363 }
 0x27d   : > { %v2246_v45 = vpop.f32.mrf.mxu0  ;;  %v2299_v18 = vpop.f32.mrf.mxu1  ;;  %v2326_v34 = vmax.f32 %v2296_v57, 0.0  ;;  %v2341_v60 = vpack.c.bf16 %v2317_v32, %v2309_v50  ;;  %v2343_v8 = vpack.c.bf16 %v2319_v33, %v2311_v19 }
 0x27e   : > { %v2247_v20 = vadd.f32 %v2246_v45, %v4192_v1  ;;  %v2300_v21 = vadd.f32 %v2299_v18, %v4192_v1  ;;  %v2325_v27 = vmax.f32 %v2245_v52, 0.0  ;;  %v2327_v2 = vmax.f32 %v2298_v13, 0.0 }
 0x27f   : > { %v2248_v7 = vpop.f32.mrf.mxu0  ;;  %v2301_v30 = vpop.f32.mrf.mxu1  ;;  %v2308_v0 = vmax.f32 %v2233_v9, 0.0 }
 0x280   : > { %v2249_v12 = vadd.f32 %v2248_v7, %v4192_v1  ;;  %v2302_v4 = vadd.f32 %v2301_v30, %v4192_v1  ;;  %v2332_v25 = vmax.f32 %v2247_v20, 0.0  ;;  %v2334_v63 = vmax.f32 %v2300_v21, 0.0  ;;  %v2570_v7 = vld [vmem:[%s4345_s7] sm:$0xf] }
 0x281   : > { %v2318_v1 = vmax.f32 %v2290_v43, 0.0  ;;  %v2340_v41 = vpack.c.bf16 %v2316_v51, %v2308_v0  ;;  %v4257_v0 = vpop.permute.xlu0 %2574 }
 0x282   : > { %v2333_v56 = vmax.f32 %v2249_v12, 0.0  ;;  %v2335_v58 = vmax.f32 %v2302_v4, 0.0  ;;  %v2348_v35 = vpack.c.bf16 %v2332_v25, %v2324_v29  ;;  %v2350_v36 = vpack.c.bf16 %v2334_v63, %v2326_v34 }
 0x283   : > { %v2342_v44 = vpack.c.bf16 %v2318_v1, %v2310_v14 }
 0x284   : > { %v2349_v62 = vpack.c.bf16 %v2333_v56, %v2325_v27  ;;  %v2351_v15 = vpack.c.bf16 %v2335_v58, %v2327_v2 }
 0x286   : > { %2472 = vmatprep.subr.bf16.mxu0 %v2349_v62  ;;  %2515 = vmatprep.subr.bf16.mxu1 %v2351_v15 }
 0x287   : > { %2473 = vmatpush1.bf16.msra.mxu0 %v2348_v35  ;;  %2516 = vmatpush1.bf16.msra.mxu1 %v2350_v36 }
 0x288   : > { %2474 = vmatprep.subr.bf16.mxu0 %v2341_v60  ;;  %2517 = vmatprep.subr.bf16.mxu1 %v2343_v8 }
 0x28b   : > { %2475 = vmatpush1.bf16.msra.mxu0 %v2340_v41  ;;  %2518 = vmatpush1.bf16.msra.mxu1 %v2342_v44 }
 0x28e   : > { %3012 = vmatmul.mubr.msk.bf16.vlgmr.msra.gmra.mxu0 %vm1454_vm0, %v4217_v59  ;;  %3013 = vmatmul.mubr.msk.bf16.vlgmr.msra.gmra.mxu1 %vm1454_vm0, %v4217_v59  ;;  %vm2577_vm0 = vcmask 130048  }
 0x28f   : > { %2613 = vmatprep.mubr.bf16.mxu0 %v3266_v53  ;;  %2654 = vmatprep.mubr.bf16.mxu1 %v3266_v53 }
 0x302   : > { %v2408_v39 = vpop.f32.mrf.mxu0 }
 0x303   : > { %v2451_v37 = vpop.f32.mrf.mxu1  ;;  %v2409_v55 = vadd.f32 %v2408_v39, %v2359_v42 }
 0x304   : > { %v2410_v40 = vpop.f32.mrf.mxu0  ;;  %v2452_v10 = vadd.f32 %v2451_v37, %v2359_v42 }
 0x305   : > { %v2453_v48 = vpop.f32.mrf.mxu1  ;;  %v2411_v24 = vadd.f32 %v2410_v40, %v2359_v42  ;;  %v2546_v52 = vmax.f32 %v2409_v55, 0.0 }
 0x306   : > { %v2412_v22 = vpop.f32.mrf.mxu0  ;;  %v2454_v61 = vadd.f32 %v2453_v48, %v2359_v42  ;;  %v2548_v21 = vmax.f32 %v2452_v10, 0.0 }
 0x307   : > { %v2413_v49 = vadd.f32 %v2412_v22, %v2364_v46  ;;  %v2455_v54 = vpop.f32.mrf.mxu1  ;;  %v2547_v17 = vmax.f32 %v2411_v24, 0.0 }
 0x308   : > { %v2456_v5 = vadd.f32 %v2455_v54, %v2364_v46  ;;  %v2414_v6 = vpop.f32.mrf.mxu0  ;;  %v2549_v13 = vmax.f32 %v2454_v61, 0.0 }
 0x309   : > { %v2415_v59 = vadd.f32 %v2414_v6, %v2364_v46  ;;  %v2457_v11 = vpop.f32.mrf.mxu1  ;;  %v2554_v16 = vmax.f32 %v2413_v49, 0.0 }
 0x30a   : > { %v2458_v38 = vadd.f32 %v2457_v11, %v2364_v46  ;;  %v2556_v45 = vmax.f32 %v2456_v5, 0.0 }
 0x30b   : > { %v2555_v18 = vmax.f32 %v2415_v59, 0.0  ;;  %v2562_v31 = vpack.c.bf16 %v2554_v16, %v2546_v52 }
 0x30c   : > { %v2557_v20 = vmax.f32 %v2458_v38, 0.0  ;;  %v2564_v57 = vpack.c.bf16 %v2556_v45, %v2548_v21 }
 0x30d   : > { %v2563_v47 = vpack.c.bf16 %v2555_v18, %v2547_v17 }
 0x30e   : > { %v2565_v23 = vpack.c.bf16 %v2557_v20, %v2549_v13 }
 0x30f   : > { %2595 = vmatprep.subr.bf16.mxu0 %v2563_v47 }
 0x310   : > { %2636 = vmatprep.subr.bf16.mxu1 %v2565_v23  ;;  %2596 = vmatpush1.bf16.msra.mxu0 %v2562_v31 }
 0x311   : > { %2637 = vmatpush1.bf16.msra.mxu1 %v2564_v57 }
 0x313   : > { %3014 = vmatmul.mubr.msk.bf16.vlgmr.msra.gmra.mxu0 %vm2577_vm0, %v2570_v7 }
 0x314   : > { %3015 = vmatmul.mubr.msk.bf16.vlgmr.msra.gmra.mxu1 %vm2577_vm0, %v2570_v7  ;;  %2695 = vmatprep.mubr.bf16.mxu0 %v3266_v53 }
 0x315   : > { %2736 = vmatprep.mubr.bf16.mxu1 %v3266_v53 }
 0x34e   : > { %v2494_v30 = vpop.f32.mrf.mxu0  ;;  %v2537_v26 = vpop.f32.mrf.mxu1 }
 0x34f   : > { %v2495_v2 = vadd.f32 %v2494_v30, %v2359_v42  ;;  %v2538_v56 = vadd.f32 %v2537_v26, %v2359_v42 }
 0x350   : > { %v2496_v43 = vpop.f32.mrf.mxu0  ;;  %v2539_v12 = vpop.f32.mrf.mxu1 }
 0x351   : > { %v2497_v33 = vadd.f32 %v2496_v43, %v2359_v42  ;;  %v2540_v25 = vadd.f32 %v2539_v12, %v2359_v42  ;;  %v2550_v51 = vmax.f32 %v2495_v2, 0.0  ;;  %v2552_v1 = vmax.f32 %v2538_v56, 0.0 }
 0x352   : > { %v2498_v4 = vpop.f32.mrf.mxu0  ;;  %v2541_v32 = vpop.f32.mrf.mxu1  ;;  %v2823_v12 = vsub.s32 0, %v3390_v3 }
 0x353   : > { %v2499_v63 = vadd.f32 %v2498_v4, %v2364_v46  ;;  %v2542_v27 = vadd.f32 %v2541_v32, %v2364_v46  ;;  %v2551_v19 = vmax.f32 %v2497_v33, 0.0  ;;  %v2553_v53 = vmax.f32 %v2540_v25, 0.0  ;;  %v2819_v33 = vpop.permute.xlu0 %2818 }
 0x354   : > { %v2500_v58 = vpop.f32.mrf.mxu0  ;;  %v2543_v9 = vpop.f32.mrf.mxu1 }
 0x355   : > { %v2501_v28 = vadd.f32 %v2500_v58, %v2364_v46  ;;  %v2544_v29 = vadd.f32 %v2543_v9, %v2364_v46  ;;  %v2558_v34 = vmax.f32 %v2499_v63, 0.0  ;;  %v2560_v50 = vmax.f32 %v2542_v27, 0.0  ;;  %v4262_v46 = vpop.permute.xlu1 %2756 }
 0x357   : > { %v2559_v62 = vmax.f32 %v2501_v28, 0.0  ;;  %v2561_v15 = vmax.f32 %v2544_v29, 0.0  ;;  %v2566_v60 = vpack.c.bf16 %v2558_v34, %v2550_v51  ;;  %v2568_v8 = vpack.c.bf16 %v2560_v50, %v2552_v1 }
 0x358   : > { %v2824_v28 = vrot.slane %v2819_v33, %v2823_v12 }
 0x359   : > { %v2567_v35 = vpack.c.bf16 %v2559_v62, %v2551_v19  ;;  %v2569_v36 = vpack.c.bf16 %v2561_v15, %v2553_v53 }
 0x35b   : > { %2677 = vmatprep.subr.bf16.mxu0 %v2567_v35  ;;  %2718 = vmatprep.subr.bf16.mxu1 %v2569_v36 }
 0x35c   : > { %2678 = vmatpush1.bf16.msra.mxu0 %v2566_v60  ;;  %2719 = vmatpush1.bf16.msra.mxu1 %v2568_v8 }
 0x35f   : > { %3016 = vmatmul.mubr.msk.bf16.vlgmr.msra.gmra.mxu0 %vm2577_vm0, %v2570_v7  ;;  %3017 = vmatmul.mubr.msk.bf16.vlgmr.msra.gmra.mxu1 %vm2577_vm0, %v2570_v7  ;;  %v3267_v7 = vmov 1966171168  }
 0x360   : > { %v2846_v30 = vunpack.c.l.s4 %v3267_v7 }
 0x362   : > { %v2847_v56 = vunpack.c.0.s8 %v2846_v30 }
 0x364   : > { %v4271_v53 = vsub.s32 %v2847_v56, %v3390_v3 }
 0x3d3   : > { %v2615_v14 = vpop.f32.mrf.mxu0 }
 0x3d4   : > { %v2616_v41 = vadd.f32 %v2615_v14, %v4257_v0  ;;  %v2656_v44 = vpop.f32.mrf.mxu1 }
 0x3d5   : > { %v2657_v39 = vadd.f32 %v2656_v44, %v4257_v0  ;;  %v2617_v37 = vpop.f32.mrf.mxu0 }
 0x3d6   : > { %v2745_v40 = vmax.f32 %v2616_v41, 0.0  ;;  %v2618_v42 = vadd.f32 %v2617_v37, %v4257_v0  ;;  %v2658_v48 = vpop.f32.mrf.mxu1 }
 0x3d7   : > { %v2747_v22 = vmax.f32 %v2657_v39, 0.0  ;;  %v2659_v24 = vadd.f32 %v2658_v48, %v4257_v0  ;;  %v2619_v49 = vpop.f32.mrf.mxu0 }
 0x3d8   : > { %v2759_v54 = vmul.f32 %v4262_v46, %v2745_v40  ;;  %v2746_v55 = vmax.f32 %v2618_v42, 0.0  ;;  %v2660_v61 = vpop.f32.mrf.mxu1 }
 0x3d9   : > { %v2761_v5 = vmul.f32 %v4262_v46, %v2747_v22  ;;  %v2748_v6 = vmax.f32 %v2659_v24, 0.0  ;;  %v2620_v10 = vpop.f32.mrf.mxu0 }
 0x3da   : > { %v2767_v59 = vrot.slane %v2759_v54, 4  ;;  %v2760_v11 = vmul.f32 %v4262_v46, %v2746_v55  ;;  %v2661_v16 = vpop.f32.mrf.mxu1 }
 0x3db   : > { %v2779_v38 = vrot.slane %v2761_v5, 4  ;;  %v2762_v17 = vmul.f32 %v4262_v46, %v2748_v6 }
 0x3dc   : > { %v2768_v45 = vadd.f32 %v2767_v59, %v2759_v54  ;;  %v2773_v18 = vrot.slane %v2760_v11, 4 }
 0x3dd   : > { %v2780_v52 = vadd.f32 %v2779_v38, %v2761_v5  ;;  %v2785_v13 = vrot.slane %v2762_v17, 4 }
 0x3de   : > { %v2769_v20 = vrot.slane %v2768_v45, 2  ;;  %v2774_v21 = vadd.f32 %v2773_v18, %v2760_v11 }
 0x3df   : > { %v2781_v47 = vrot.slane %v2780_v52, 2  ;;  %v2786_v31 = vadd.f32 %v2785_v13, %v2762_v17 }
 0x3e0   : > { %v2770_v23 = vadd.f32 %v2769_v20, %v2768_v45  ;;  %v2775_v57 = vrot.slane %v2774_v21, 2 }
 0x3e1   : > { %v2782_v26 = vadd.f32 %v2781_v47, %v2780_v52  ;;  %v2787_v43 = vrot.slane %v2786_v31, 2 }
 0x3e2   : > { %v2771_v4 = vrot.slane %v2770_v23, 1  ;;  %v2776_v32 = vadd.f32 %v2775_v57, %v2774_v21 }
 0x3e3   : > { %v2783_v25 = vrot.slane %v2782_v26, 1  ;;  %v2788_v63 = vadd.f32 %v2787_v43, %v2786_v31 }
 0x3e4   : > { %v2772_v27 = vadd.f32 %v2771_v4, %v2770_v23  ;;  %v2777_v2 = vrot.slane %v2776_v32, 1 }
 0x3e5   : > { %v2784_v58 = vadd.f32 %v2783_v25, %v2782_v26  ;;  %v2789_v9 = vrot.slane %v2788_v63, 1 }
 0x3e6   : > { %v2778_v29 = vadd.f32 %v2777_v2, %v2776_v32  ;;  %v2825_v50 = vadd.f32 %v2824_v28, %v2772_v27 }
 0x3e7   : > { %v2790_v34 = vadd.f32 %v2789_v9, %v2788_v63  ;;  %v2827_v62 = vadd.f32 %v2824_v28, %v2784_v58 }
 0x3e8   : > { %v2826_v19 = vadd.f32 %v2824_v28, %v2778_v29 }
 0x3e9   : > { %v2828_v15 = vadd.f32 %v2824_v28, %v2790_v34 }
 0x3ea   : > { %v2841_v51 = vcombine.low %v2825_v50, %v2826_v19 }
 0x3eb   : > { %v2842_v1 = vcombine.low %v2827_v62, %v2828_v15 }
 0x3ec   : > { %v2851_v35 = vrot.slane %v2841_v51, %v4271_v53 }
 0x3ed   : > { %v2858_v36 = vrot.slane %v2842_v1, %v4271_v53 }
 0x3ef   : > { %v2873_v60 = vcombine.low %v2851_v35, %v2858_v36 }
 0x3f1   : > { %v2881_v50 = vrot.slane %v2873_v60, %v4271_v53 }
 0x41f   : > { %v2697_v8 = vpop.f32.mrf.mxu0  ;;  %v2738_v14 = vpop.f32.mrf.mxu1 }
 0x420   : > { %v2698_v41 = vadd.f32 %v2697_v8, %v4257_v0  ;;  %v2739_v44 = vadd.f32 %v2738_v14, %v4257_v0 }
 0x421   : > { %v2699_v39 = vpop.f32.mrf.mxu0  ;;  %v2740_v37 = vpop.f32.mrf.mxu1 }
 0x422   : > { %v2749_v40 = vmax.f32 %v2698_v41, 0.0  ;;  %v2751_v3 = vmax.f32 %v2739_v44, 0.0  ;;  %v2700_v42 = vadd.f32 %v2699_v39, %v4257_v0  ;;  %v2741_v48 = vadd.f32 %v2740_v37, %v4257_v0 }
 0x423   : > { %v2701_v22 = vpop.f32.mrf.mxu0  ;;  %v2742_v24 = vpop.f32.mrf.mxu1 }
 0x424   : > { %v2763_v49 = vmul.f32 %v4262_v46, %v2749_v40  ;;  %v2765_v54 = vmul.f32 %v4262_v46, %v2751_v3  ;;  %v2750_v55 = vmax.f32 %v2700_v42, 0.0  ;;  %v2752_v61 = vmax.f32 %v2741_v48, 0.0 }
 0x425   : > { %v2702_v5 = vpop.f32.mrf.mxu0  ;;  %v2743_v6 = vpop.f32.mrf.mxu1 }
 0x426   : > { %v2791_v10 = vrot.slane %v2763_v49, 4  ;;  %v2803_v59 = vrot.slane %v2765_v54, 4  ;;  %v2764_v11 = vmul.f32 %v4262_v46, %v2750_v55  ;;  %v2766_v16 = vmul.f32 %v4262_v46, %v2752_v61 }
 0x428   : > { %v2792_v38 = vadd.f32 %v2791_v10, %v2763_v49  ;;  %v2804_v17 = vadd.f32 %v2803_v59, %v2765_v54  ;;  %v2797_v45 = vrot.slane %v2764_v11, 4  ;;  %v2809_v0 = vrot.slane %v2766_v16, 4 }
 0x42a   : > { %v2793_v18 = vrot.slane %v2792_v38, 2  ;;  %v2805_v52 = vrot.slane %v2804_v17, 2  ;;  %v2798_v13 = vadd.f32 %v2797_v45, %v2764_v11  ;;  %v2810_v20 = vadd.f32 %v2809_v0, %v2766_v16 }
 0x42c   : > { %v2794_v21 = vadd.f32 %v2793_v18, %v2792_v38  ;;  %v2806_v47 = vadd.f32 %v2805_v52, %v2804_v17  ;;  %v2799_v31 = vrot.slane %v2798_v13, 2  ;;  %v2811_v23 = vrot.slane %v2810_v20, 2 }
 0x42e   : > { %v2795_v57 = vrot.slane %v2794_v21, 1  ;;  %v2807_v7 = vrot.slane %v2806_v47, 1  ;;  %v2800_v30 = vadd.f32 %v2799_v31, %v2798_v13  ;;  %v2812_v26 = vadd.f32 %v2811_v23, %v2810_v20 }
 0x430   : > { %v2796_v43 = vadd.f32 %v2795_v57, %v2794_v21  ;;  %v2808_v12 = vadd.f32 %v2807_v7, %v2806_v47  ;;  %v2801_v46 = vrot.slane %v2800_v30, 1  ;;  %v2813_v4 = vrot.slane %v2812_v26, 1 }
 0x432   : > { %v2802_v32 = vadd.f32 %v2801_v46, %v2800_v30  ;;  %v2814_v33 = vadd.f32 %v2813_v4, %v2812_v26  ;;  %v2829_v25 = vadd.f32 %v2824_v28, %v2796_v43  ;;  %v2831_v63 = vadd.f32 %v2824_v28, %v2808_v12 }
 0x434   : > { %v2830_v27 = vadd.f32 %v2824_v28, %v2802_v32  ;;  %v2832_v2 = vadd.f32 %v2824_v28, %v2814_v33 }
 0x436   : > { %v2843_v56 = vcombine.low %v2829_v25, %v2830_v27  ;;  %v2844_v58 = vcombine.low %v2831_v63, %v2832_v2 }
 0x438   : > { %v2865_v9 = vrot.slane %v2843_v56, %v4271_v53  ;;  %v2872_v29 = vrot.slane %v2844_v58, %v4271_v53 }
 0x43a   : > { %v2874_v34 = vcombine.low %v2865_v9, %v2872_v29 }
 0x43c   : > { %v2888_v19 = vrot.slane %v2874_v34, %v4271_v53  ;;  %2899 = sbr.rel (!%p3370_p5) target bundleno = 1115 (0x45b), region = 68 }
 0x43e   : > { %v2889_v62 = vcombine.low %v2881_v50, %v2888_v19 }
 0x440   : > { %2891 = vst [vmem:[%s394_s26] sm:$0xff] %v2889_v62 }
 0x441   : > { %s4357_s14 = smov (!%p2902_p11, %s2901_s14), 8 }
 0x442   : > { %s4296_s15 = sshll.u32 %s4357_s14, 4 }
 0x443   : > { %s2906_s16 = ssub.s32 128, %s4296_s15 }
 0x444   : > { %2907 = vsyncadd %s4291_s12, %s2906_s16  ;;  %p3021_p12 = scmp.ne.s32.totalorder %s4296_s15, 0  ;;  %s2910_s28 = scalar_lea.hbm %s4349_s11, %s3381_s30 }
 0x445   : > { %s2912_s18 = sshll.u32 %s394_s26, 4  ;;  %s3268_s25 = smov [#allocation3]   ;;  %s2913_s18 = int_to_ptr.vmem [resolvable:$true] %s2912_s18 }
 0x446   : > { %s3204_s10 = scalar_lea.vmem %s2913_s18, %s4296_s15  ;;  %s3208_s13 = sshll.u32 %s3268_s25, 4  ;;  %s3209_s13 = int_to_ptr.vmem [resolvable:$false] %s3208_s13 }
 0x447   : > { %p3205_p13 = scmp.ne.s32.totalorder %s2913_s18, %s3204_s10  ;;  %s3210_s14 = scalar_lea.vmem %s3209_s13, 256 }
 0x448   : > { %p3211_p2 = scmp.lt.s32.totalorder %s2913_s18, %s3209_s13  ;;  %p3212_p3 = scmp.lt.s32.totalorder %s3210_s14, %s3204_s10 }
 0x449   : > { %p3206_p0 = pnand %p3205_p13, %p3021_p12 }
 0x44a   : > { %p3213_p4 = por %p3212_p3, %p3211_p2 }
 0x44b   : > { %p3207_p1 = pneg %p3206_p0 }
 0x44d   : > { %p3214_p5 = pnand %p3213_p4, %p3207_p1 }
 0x44f   : > { %3217 = shalt.err (!%p3214_p5)
}
 0x450   : > { %s3218_s16 = scalar_lea.hbm %s2910_s28, %s4296_s15  ;;  %s3222_s23 = scalar_lea.hbm %s4349_s11, 160 }
 0x451   : > { %p3219_p7 = scmp.ne.s32.totalorder %s2910_s28, %s3218_s16  ;;  %p3223_p10 = scmp.lt.s32.totalorder %s2910_s28, %s4349_s11 }
 0x452   : > { %p3224_p11 = scmp.lt.s32.totalorder %s3222_s23, %s3218_s16 }
 0x453   : > { %p3220_p8 = pnand %p3219_p7, %p3021_p12 }
 0x454   : > { %p3225_p13 = por %p3224_p11, %p3223_p10 }
 0x455   : > { %p3221_p9 = pneg %p3220_p8 }
 0x457   : > { %p3226_p0 = pnand %p3225_p13, %p3221_p9 }
 0x459   : > { %3229 = shalt.err (!%p3226_p0)
}
 0x45a   : > { %2915 = dma.vmem_to_hbm [thread:$0]  (%p3021_p12), %s2913_s18, %s4296_s15, %s2910_s28, %s4291_s12  }
 0x45b PF: > { %p3159_p1 = scmp.ge.s32.totalorder %s3264_s22, 2  ;;  %s2924_s10 = sand.u32 1, %s3252_s19  }
 0x45c   : > { %s2925_s13 = scalar_lea.sflag [#allocation4], %s2924_s10 }
 0x45d   : > { %p3156_p2 = pnand %p3159_p1, %p3374_p6 }
 0x45f   : > { %p3157_p3 = pneg %p3156_p2 }
 0x461   : > { %3247 = dma.done.wait (%p3157_p3), %s2925_s13, 128  }
 0x462   : > { %3249 = vsyncadd (%p3157_p3), %s2925_s13, 4294967168  ;;  %p23_p4 = scmp.ge.s32.totalorder %s3357_s24, 4   ;;  %s4352_s19 = smov %s3256_s20 }
 0x463   : > { %s4353_s20 = smov %s3260_s21  ;;  %s4354_s21 = smov %s3368_s27 }
 0x464   : > { %s4355_s22 = smov %s3357_s24  ;;  %25 = sbr.rel (!%p23_p4) target bundleno = 6 (0x6), region = 99 }
 0x469   :  { %2930 = vsyncpa [#allocation4], 1 }
 0x46a   :  { %2932 = vsyncpa [#allocation4 + $0x1], 1 }

</bundles_post_ra>
